<compile_context>
chip_gen: v7x
topology: tpu7x:2x2x1
jax: 0.10.0
libtpu: 0.0.40
codegen_flags: <defaults>
</compile_context>

<pallas_src>
import math
from functools import partial

import jax
import jax.numpy as jnp
from jax import lax
from jax.experimental import pallas as pl
from jax.experimental.pallas import tpu as pltpu

_LANE = 128
_SUBLANE = 8


def _round_up(x, m):
    return ((x + m - 1) // m) * m


# ---------------------------------------------------------------------------
# Kernel: grid = (direction, time_chunk).  Each grid step runs `Tc` timesteps
# of one direction with the recurrent state carried in VMEM scratch.
# Gate order follows PyTorch: i, f, g, o (concatenated along the lane dim).
# ---------------------------------------------------------------------------
def _bilstm_chunk_kernel(x_ref, mask_ref, wih_ref, whh_ref, b_ref, out_ref,
                         h_scr, c_scr, *, Tc, Hp, unroll):
    d = pl.program_id(0)    # 0 = forward, 1 = backward
    ci = pl.program_id(1)   # time-chunk index (index_map already remaps for bwd)

    @pl.when(ci == 0)
    def _():
        h_scr[...] = jnp.zeros_like(h_scr)
        c_scr[...] = jnp.zeros_like(c_scr)

    wih = wih_ref[0]   # (2C, 4Hp)  bf16
    whh = whh_ref[0]   # (Hp, 4Hp)  bf16
    bias = b_ref[0]    # (1, 4Hp)   f32

    def step(tt, carry):
        h, c_state = carry
        # forward: idx = tt ; backward: idx = Tc - 1 - tt
        idx = tt * (1 - 2 * d) + d * (Tc - 1)
        x_t = x_ref[idx]        # (Bp, 2C) bf16
        m_t = mask_ref[idx]     # (Bp, 1)  f32  (1.0 on valid frames)

        pre = (jnp.dot(x_t, wih, preferred_element_type=jnp.float32)
               + jnp.dot(h.astype(jnp.bfloat16), whh,
                         preferred_element_type=jnp.float32)
               + bias)          # (Bp, 4Hp) f32

        i_g = jax.nn.sigmoid(pre[:, 0 * Hp:1 * Hp])
        f_g = jax.nn.sigmoid(pre[:, 1 * Hp:2 * Hp])
        g_g = jnp.tanh(pre[:, 2 * Hp:3 * Hp])
        o_g = jax.nn.sigmoid(pre[:, 3 * Hp:4 * Hp])

        c_new = f_g * c_state + i_g * g_g
        h_new = o_g * jnp.tanh(c_new)

        # Only advance the recurrent state on valid frames (packed-sequence
        # semantics; makes the in-kernel backward pass exact without gathers).
        h_sel = h + m_t * (h_new - h)
        c_sel = c_state + m_t * (c_new - c_state)

        out_ref[0, idx] = h_sel
        return h_sel, c_sel

    h0 = h_scr[...]
    c0 = c_scr[...]
    hT, cT = lax.fori_loop(0, Tc, step, (h0, c0), unroll=unroll)
    h_scr[...] = hT
    c_scr[...] = cT


def _run_bilstm(x_tbc, mask, wih, whh, b, *, chunk):
    """x_tbc: (T2p, Bp, 2C) bf16, mask: (T2p, Bp, 1) f32.
    Returns (2, T2p, Bp, Hp) f32 hidden states (dir 0 = fwd, dir 1 = bwd)."""
    T2p, Bp, C2 = x_tbc.shape
    Hp = whh.shape[1]
    assert T2p % chunk == 0
    NC = T2p // chunk
    Tc = chunk
    unroll = Tc <= 32

    # time-chunk remap: forward -> ci, backward -> NC - 1 - ci
    t_map = lambda d, ci: (ci * (1 - 2 * d) + d * (NC - 1), 0, 0)

    kernel = partial(_bilstm_chunk_kernel, Tc=Tc, Hp=Hp, unroll=unroll)
    return pl.pallas_call(
        kernel,
        out_shape=jax.ShapeDtypeStruct((2, T2p, Bp, Hp), jnp.float32),
        grid_spec=pltpu.PrefetchScalarGridSpec(
            num_scalar_prefetch=0,
            grid=(2, NC),
            in_specs=[
                pl.BlockSpec((Tc, Bp, C2), t_map),                       # x chunk
                pl.BlockSpec((Tc, Bp, 1), t_map),                        # valid mask
                pl.BlockSpec((1, C2, 4 * Hp), lambda d, ci: (d, 0, 0)),  # W_ih (fused gates)
                pl.BlockSpec((1, Hp, 4 * Hp), lambda d, ci: (d, 0, 0)),  # W_hh (fused gates)
                pl.BlockSpec((1, 1, 4 * Hp), lambda d, ci: (d, 0, 0)),   # b_ih + b_hh
            ],
            out_specs=pl.BlockSpec(
                (1, Tc, Bp, Hp),
                lambda d, ci: (d, ci * (1 - 2 * d) + d * (NC - 1), 0, 0)),
            scratch_shapes=[
                pltpu.VMEM((Bp, Hp), jnp.float32),   # h carry
                pltpu.VMEM((Bp, Hp), jnp.float32),   # c carry
            ],
        ),
        compiler_params=pltpu.CompilerParams(
            # directions are independent -> 2-TC parallel on v7x;
            # time chunks carry recurrent state -> arbitrary (sequential).
            dimension_semantics=("parallel", "arbitrary")),
    )(x_tbc, mask, wih, whh, b)


# ---------------------------------------------------------------------------
# Parameters (PyTorch nn.LSTM init U(-1/sqrt(H), 1/sqrt(H))), repacked as
# fused-gate, lane-padded matrices: W_ih (2, 2C, 4Hp), W_hh (2, Hp, 4Hp),
# b (2, 1, 4Hp).  Padded hidden lanes have zero weights/bias, so they stay
# identically zero and never contaminate the real lanes.
# ---------------------------------------------------------------------------
def init_pblstm_params(key, input_dim, hidden_dim):
    in_sz = 2 * input_dim
    H = hidden_dim
    Hp = _round_up(H, _LANE)
    bound = 1.0 / math.sqrt(H)
    keys = jax.random.split(key, 8)

    def u(k, shape):
        return jax.random.uniform(k, shape, jnp.float32, -bound, bound)

    def pack_dir(k0, k1, k2, k3):
        w_ih = u(k0, (4 * H, in_sz))   # PyTorch layout, gate order i,f,g,o
        w_hh = u(k1, (4 * H, H))
        b_ih = u(k2, (4 * H,))
        b_hh = u(k3, (4 * H,))
        wih = jnp.zeros((in_sz, 4 * Hp), jnp.float32)
        whh = jnp.zeros((Hp, 4 * Hp), jnp.float32)
        bb = jnp.zeros((1, 4 * Hp), jnp.float32)
        for g in range(4):
            wih = wih.at[:, g * Hp:g * Hp + H].set(w_ih[g * H:(g + 1) * H, :].T)
            whh = whh.at[:H, g * Hp:g * Hp + H].set(w_hh[g * H:(g + 1) * H, :].T)
            bb = bb.at[0, g * Hp:g * Hp + H].set(
                b_ih[g * H:(g + 1) * H] + b_hh[g * H:(g + 1) * H])
        return wih, whh, bb

    wih_f, whh_f, b_f = pack_dir(*keys[0:4])
    wih_b, whh_b, b_b = pack_dir(*keys[4:8])
    return dict(
        wih=jnp.stack([wih_f, wih_b]).astype(jnp.bfloat16),   # (2, 2C, 4Hp)
        whh=jnp.stack([whh_f, whh_b]).astype(jnp.bfloat16),   # (2, Hp, 4Hp)
        b=jnp.stack([b_f, b_b]),                               # (2, 1, 4Hp) f32
        hidden_dim=H, hidden_pad=Hp)


# ---------------------------------------------------------------------------
# PBLSTM forward
# ---------------------------------------------------------------------------
def pblstm_forward(x, lengths, params, *, time_chunk=32):
    """x: (B, T, C) padded f32, lengths: (B,) int32.
    Returns (out (B, T//2, 2H) f32 with zeros at padded positions, lengths//2)."""
    B, T, C = x.shape
    if T % 2 == 1:
        x = x[:, :-1, :]
        T -= 1
    T2 = T // 2
    lengths2 = lengths // 2

    # pyramidal pooling: concatenate adjacent timesteps along features
    x = x.reshape(B, T2, 2 * C)
    # LockedDropOut is identity in eval mode.
    # TODO(synk): training-mode locked dropout (shared (B,1,2C) mask) not implemented.

    H = params["hidden_dim"]
    Hp = params["hidden_pad"]

    Bp = _round_up(B, _SUBLANE)            # full sublane occupancy
    Tc = min(time_chunk, T2)               # time chunk
    T2p = _round_up(T2, Tc)                # pad time to a chunk multiple

    x_p = jnp.zeros((Bp, T2p, 2 * C), jnp.float32).at[:B, :T2].set(x)
    x_tbc = jnp.transpose(x_p, (1, 0, 2)).astype(jnp.bfloat16)   # (T2p, Bp, 2C)

    len_p = jnp.zeros((Bp,), lengths2.dtype).at[:B].set(lengths2)
    t_idx = jnp.arange(T2p, dtype=lengths2.dtype)
    mask = (t_idx[:, None] < len_p[None, :]).astype(jnp.float32)[:, :, None]  # (T2p,Bp,1)

    out = _run_bilstm(x_tbc, mask, params["wih"], params["whh"], params["b"],
                      chunk=Tc)                                   # (2, T2p, Bp, Hp)

    out_f = jnp.transpose(out[0, :T2, :B, :H], (1, 0, 2))         # (B, T2, H)
    out_b = jnp.transpose(out[1, :T2, :B, :H], (1, 0, 2))         # (B, T2, H)
    res = jnp.concatenate([out_f, out_b], axis=-1)                # (B, T2, 2H)

    v = (jnp.arange(T2)[None, :] < lengths2[:, None]).astype(res.dtype)
    res = res * v[:, :, None]              # pad_packed_sequence zero padding
    return res, lengths2


# ---------------------------------------------------------------------------
# Pure-JAX reference (same bf16-rounded operands) for a numerics sanity check.
# ---------------------------------------------------------------------------
def _reference_bilstm(x, lengths, params):
    B, T, C = x.shape
    if T % 2 == 1:
        x = x[:, :-1, :]
        T -= 1
    T2 = T // 2
    lengths2 = lengths // 2
    xr = x.reshape(B, T2, 2 * C).astype(jnp.bfloat16).astype(jnp.float32)

    H, Hp = params["hidden_dim"], params["hidden_pad"]
    wih = params["wih"].astype(jnp.float32)
    whh = params["whh"].astype(jnp.float32)
    bias = params["b"]
    valid = (jnp.arange(T2)[None, :] < lengths2[:, None]).astype(jnp.float32)  # (B,T2)

    def run_dir(d, reverse):
        def step(carry, inp):
            h, c = carry
            x_t, m_t = inp
            hb = h.astype(jnp.bfloat16).astype(jnp.float32)
            pre = x_t @ wih[d] + hb @ whh[d] + bias[d]
            i = jax.nn.sigmoid(pre[:, :Hp])
            f = jax.nn.sigmoid(pre[:, Hp:2 * Hp])
            g = jnp.tanh(pre[:, 2 * Hp:3 * Hp])
            o = jax.nn.sigmoid(pre[:, 3 * Hp:4 * Hp])
            c_new = f * c + i * g
            h_new = o * jnp.tanh(c_new)
            h = h + m_t * (h_new - h)
            c = c + m_t * (c_new - c)
            return (h, c), h

        xs = jnp.transpose(xr, (1, 0, 2))       # (T2, B, 2C)
        ms = valid.T[:, :, None]                # (T2, B, 1)
        if reverse:
            xs, ms = xs[::-1], ms[::-1]
        (_, _), hs = lax.scan(step,
                              (jnp.zeros((B, Hp)), jnp.zeros((B, Hp))), (xs, ms))
        if reverse:
            hs = hs[::-1]
        return jnp.transpose(hs, (1, 0, 2))[:, :, :H]

    ref = jnp.concatenate([run_dir(0, False), run_dir(1, True)], axis=-1)
    return ref * valid[:, :, None], lengths2


if __name__ == "__main__":
    key = jax.random.PRNGKey(0)
    B, T, C = 2, 8, 8          # batch, padded time, input_dim
    H = 16                     # hidden_dim
    k_x, k_p = jax.random.split(key)

    x = jax.random.normal(k_x, (B, T, C), jnp.float32)
    lengths = jnp.array([8, 6], dtype=jnp.int32)
    params = init_pblstm_params(k_p, input_dim=C, hidden_dim=H)

    out, new_lengths = pblstm_forward(x, lengths, params)
    out = jax.block_until_ready(out)

    assert out.shape == (B, T // 2, 2 * H), out.shape
    assert out.dtype == jnp.float32
    # padded positions must be exactly zero (pack/pad-packed semantics)
    assert float(jnp.abs(out[1, int(new_lengths[1]):]).max()) == 0.0

    ref, _ = _reference_bilstm(x, lengths, params)
    assert bool(jnp.allclose(out, ref, atol=2e-2, rtol=2e-2)), \
        float(jnp.abs(out - ref).max())

    print("KERNEL_OK")
</pallas_src>

<mosaic_0001>
module attributes {stable_mosaic.version = 11 : i64} {
  func.func @_bilstm_chunk_kernel(%arg0: i32, %arg1: i32, %arg2: memref<4x8x16xbf16, #tpu.memory_space<vmem>>, %arg3: memref<4x8x1xf32, #tpu.memory_space<vmem>>, %arg4: memref<1x16x512xbf16, #tpu.memory_space<vmem>>, %arg5: memref<1x128x512xbf16, #tpu.memory_space<vmem>>, %arg6: memref<1x1x512xf32, #tpu.memory_space<vmem>>, %arg7: memref<1x4x8x128xf32, #tpu.memory_space<vmem>>, %arg8: memref<8x128xf32, #tpu.memory_space<vmem>>, %arg9: memref<8x128xf32, #tpu.memory_space<vmem>>) attributes {dimension_semantics = [#tpu.dimension_semantics<parallel>, #tpu.dimension_semantics<arbitrary>], iteration_bounds = array<i64: 2, 1>, scalar_prefetch = 0 : i64, scratch_operands = 2 : i64, tpu.core_type = #tpu.core_type<tc>, window_params = [{transform_indices = @transform_0, window_bounds = array<i64: 4, 8, 16>}, {transform_indices = @transform_1, window_bounds = array<i64: 4, 8, 1>}, {transform_indices = @transform_2, window_bounds = array<i64: 1, 16, 512>}, {transform_indices = @transform_3, window_bounds = array<i64: 1, 128, 512>}, {transform_indices = @transform_4, window_bounds = array<i64: 1, 1, 512>}, {transform_indices = @transform_5, window_bounds = array<i64: 1, 4, 8, 128>}]} {
    %c0_i32 = arith.constant 0 : i32
    %0 = arith.cmpi eq, %arg1, %c0_i32 : i32
    %1 = arith.extui %0 : i1 to i32
    %c0_i32_0 = arith.constant 0 : i32
    %2 = arith.cmpi ne, %1, %c0_i32_0 : i32
    scf.if %2 {
      %cst_77 = arith.constant 0.000000e+00 : f32
      %229 = vector.broadcast %cst_77 : f32 to vector<8x128xf32>
      %c0_78 = arith.constant 0 : index
      %c0_79 = arith.constant 0 : index
      %230 = vector.load %arg8[%c0_78, %c0_79] : memref<8x128xf32, #tpu.memory_space<vmem>>, vector<8x128xf32>
      tpu.vector_store %arg8[%c0_78, %c0_79], %229 {strides = array<i32>} : memref<8x128xf32, #tpu.memory_space<vmem>>, vector<8x128xf32>,
      %cst_80 = arith.constant 0.000000e+00 : f32
      %231 = vector.broadcast %cst_80 : f32 to vector<8x128xf32>
      %c0_81 = arith.constant 0 : index
      %c0_82 = arith.constant 0 : index
      %232 = vector.load %arg9[%c0_81, %c0_82] : memref<8x128xf32, #tpu.memory_space<vmem>>, vector<8x128xf32>
      tpu.vector_store %arg9[%c0_81, %c0_82], %231 {strides = array<i32>} : memref<8x128xf32, #tpu.memory_space<vmem>>, vector<8x128xf32>,
    } else {
    }
    %c0 = arith.constant 0 : index
    %c0_1 = arith.constant 0 : index
    %c0_2 = arith.constant 0 : index
    %3 = vector.load %arg4[%c0, %c0_1, %c0_2] : memref<1x16x512xbf16, #tpu.memory_space<vmem>>, vector<1x16x512xbf16>
    %4 = vector.shape_cast %3 : vector<1x16x512xbf16> to vector<16x512xbf16>
    %c0_3 = arith.constant 0 : index
    %c0_4 = arith.constant 0 : index
    %c0_5 = arith.constant 0 : index
    %5 = vector.load %arg5[%c0_3, %c0_4, %c0_5] : memref<1x128x512xbf16, #tpu.memory_space<vmem>>, vector<1x128x512xbf16>
    %6 = vector.shape_cast %5 : vector<1x128x512xbf16> to vector<128x512xbf16>
    %c0_6 = arith.constant 0 : index
    %c0_7 = arith.constant 0 : index
    %c0_8 = arith.constant 0 : index
    %7 = vector.load %arg6[%c0_6, %c0_7, %c0_8] : memref<1x1x512xf32, #tpu.memory_space<vmem>>, vector<1x1x512xf32>
    %8 = vector.shape_cast %7 : vector<1x1x512xf32> to vector<1x512xf32>
    %c0_9 = arith.constant 0 : index
    %c0_10 = arith.constant 0 : index
    %9 = vector.load %arg8[%c0_9, %c0_10] : memref<8x128xf32, #tpu.memory_space<vmem>>, vector<8x128xf32>
    %c0_11 = arith.constant 0 : index
    %c0_12 = arith.constant 0 : index
    %10 = vector.load %arg9[%c0_11, %c0_12] : memref<8x128xf32, #tpu.memory_space<vmem>>, vector<8x128xf32>
    %c0_i32_13 = arith.constant 0 : i32
    %c2_i32 = arith.constant 2 : i32
    %11 = arith.muli %c2_i32, %arg0 : i32
    %c1_i32 = arith.constant 1 : i32
    %12 = arith.subi %c1_i32, %11 : i32
    %13 = arith.muli %c0_i32_13, %12 : i32
    %c3_i32 = arith.constant 3 : i32
    %14 = arith.muli %arg0, %c3_i32 : i32
    %15 = arith.addi %13, %14 : i32
    %16 = arith.index_cast %15 : i32 to index
    %c0_14 = arith.constant 0 : index
    %c0_15 = arith.constant 0 : index
    %17 = vector.load %arg2[%16, %c0_14, %c0_15] : memref<4x8x16xbf16, #tpu.memory_space<vmem>>, vector<1x8x16xbf16>
    %18 = vector.shape_cast %17 : vector<1x8x16xbf16> to vector<8x16xbf16>
    %19 = arith.index_cast %15 : i32 to index
    %c0_16 = arith.constant 0 : index
    %c0_17 = arith.constant 0 : index
    %20 = vector.load %arg3[%19, %c0_16, %c0_17] : memref<4x8x1xf32, #tpu.memory_space<vmem>>, vector<1x8x1xf32>
    %21 = vector.shape_cast %20 : vector<1x8x1xf32> to vector<8x1xf32>
    %cst = arith.constant dense<0.000000e+00> : vector<8x512xf32>
    %22 = tpu.matmul %18, %4, %cst {dimension_numbers = #tpu.dot_dimension_numbers<[1], [0], [0], [1], [0, 0, 1, 1], [], []>} : vector<8x16xbf16>, vector<16x512xbf16>, vector<8x512xf32> -> vector<8x512xf32>
    %23 = arith.truncf %9 : vector<8x128xf32> to vector<8x128xbf16>
    %cst_18 = arith.constant dense<0.000000e+00> : vector<8x512xf32>
    %24 = tpu.matmul %23, %6, %cst_18 {dimension_numbers = #tpu.dot_dimension_numbers<[1], [0], [0], [1], [0, 0, 1, 1], [], []>} : vector<8x128xbf16>, vector<128x512xbf16>, vector<8x512xf32> -> vector<8x512xf32>
    %25 = arith.addf %22, %24 : vector<8x512xf32>
    %26 = vector.broadcast %8 : vector<1x512xf32> to vector<8x512xf32>
    %27 = arith.addf %25, %26 : vector<8x512xf32>
    %28 = vector.extract_strided_slice %27 {offsets = [0, 0], sizes = [8, 128], strides = [1, 1]} : vector<8x512xf32> to vector<8x128xf32>
    %29 = arith.negf %28 : vector<8x128xf32>
    %30 = math.exp %29 : vector<8x128xf32>
    %cst_19 = arith.constant 1.000000e+00 : f32
    %31 = vector.broadcast %cst_19 : f32 to vector<8x128xf32>
    %32 = arith.addf %31, %30 : vector<8x128xf32>
    %33 = arith.divf %31, %32 : vector<8x128xf32>
    %34 = vector.extract_strided_slice %27 {offsets = [0, 128], sizes = [8, 128], strides = [1, 1]} : vector<8x512xf32> to vector<8x128xf32>
    %35 = arith.negf %34 : vector<8x128xf32>
    %36 = math.exp %35 : vector<8x128xf32>
    %cst_20 = arith.constant 1.000000e+00 : f32
    %37 = vector.broadcast %cst_20 : f32 to vector<8x128xf32>
    %38 = arith.addf %37, %36 : vector<8x128xf32>
    %39 = arith.divf %37, %38 : vector<8x128xf32>
    %40 = vector.extract_strided_slice %27 {offsets = [0, 256], sizes = [8, 128], strides = [1, 1]} : vector<8x512xf32> to vector<8x128xf32>
    %41 = math.tanh %40 : vector<8x128xf32>
    %42 = vector.extract_strided_slice %27 {offsets = [0, 384], sizes = [8, 128], strides = [1, 1]} : vector<8x512xf32> to vector<8x128xf32>
    %43 = arith.negf %42 : vector<8x128xf32>
    %44 = math.exp %43 : vector<8x128xf32>
    %cst_21 = arith.constant 1.000000e+00 : f32
    %45 = vector.broadcast %cst_21 : f32 to vector<8x128xf32>
    %46 = arith.addf %45, %44 : vector<8x128xf32>
    %47 = arith.divf %45, %46 : vector<8x128xf32>
    %48 = arith.mulf %39, %10 : vector<8x128xf32>
    %49 = arith.mulf %33, %41 : vector<8x128xf32>
    %50 = arith.addf %48, %49 : vector<8x128xf32>
    %51 = math.tanh %50 : vector<8x128xf32>
    %52 = arith.mulf %47, %51 : vector<8x128xf32>
    %53 = arith.subf %52, %9 : vector<8x128xf32>
    %54 = vector.broadcast %21 : vector<8x1xf32> to vector<8x128xf32>
    %55 = arith.mulf %54, %53 : vector<8x128xf32>
    %56 = arith.addf %9, %55 : vector<8x128xf32>
    %57 = arith.subf %50, %10 : vector<8x128xf32>
    %58 = vector.broadcast %21 : vector<8x1xf32> to vector<8x128xf32>
    %59 = arith.mulf %58, %57 : vector<8x128xf32>
    %60 = arith.addf %10, %59 : vector<8x128xf32>
    %c0_22 = arith.constant 0 : index
    %61 = arith.index_cast %15 : i32 to index
    %c0_23 = arith.constant 0 : index
    %c0_24 = arith.constant 0 : index
    %62 = vector.load %arg7[%c0_22, %61, %c0_23, %c0_24] : memref<1x4x8x128xf32, #tpu.memory_space<vmem>>, vector<1x1x8x128xf32>
    %63 = vector.shape_cast %62 : vector<1x1x8x128xf32> to vector<8x128xf32>
    %64 = vector.shape_cast %56 : vector<8x128xf32> to vector<1x1x8x128xf32>
    tpu.vector_store %arg7[%c0_22, %61, %c0_23, %c0_24], %64 {strides = array<i32>} : memref<1x4x8x128xf32, #tpu.memory_space<vmem>>, vector<1x1x8x128xf32>,
    %c1_i32_25 = arith.constant 1 : i32
    %c2_i32_26 = arith.constant 2 : i32
    %65 = arith.muli %c2_i32_26, %arg0 : i32
    %c1_i32_27 = arith.constant 1 : i32
    %66 = arith.subi %c1_i32_27, %65 : i32
    %67 = arith.muli %c1_i32_25, %66 : i32
    %c3_i32_28 = arith.constant 3 : i32
    %68 = arith.muli %arg0, %c3_i32_28 : i32
    %69 = arith.addi %67, %68 : i32
    %70 = arith.index_cast %69 : i32 to index
    %c0_29 = arith.constant 0 : index
    %c0_30 = arith.constant 0 : index
    %71 = vector.load %arg2[%70, %c0_29, %c0_30] : memref<4x8x16xbf16, #tpu.memory_space<vmem>>, vector<1x8x16xbf16>
    %72 = vector.shape_cast %71 : vector<1x8x16xbf16> to vector<8x16xbf16>
    %73 = arith.index_cast %69 : i32 to index
    %c0_31 = arith.constant 0 : index
    %c0_32 = arith.constant 0 : index
    %74 = vector.load %arg3[%73, %c0_31, %c0_32] : memref<4x8x1xf32, #tpu.memory_space<vmem>>, vector<1x8x1xf32>
    %75 = vector.shape_cast %74 : vector<1x8x1xf32> to vector<8x1xf32>
    %cst_33 = arith.constant dense<0.000000e+00> : vector<8x512xf32>
    %76 = tpu.matmul %72, %4, %cst_33 {dimension_numbers = #tpu.dot_dimension_numbers<[1], [0], [0], [1], [0, 0, 1, 1], [], []>} : vector<8x16xbf16>, vector<16x512xbf16>, vector<8x512xf32> -> vector<8x512xf32>
    %77 = arith.truncf %56 : vector<8x128xf32> to vector<8x128xbf16>
    %cst_34 = arith.constant dense<0.000000e+00> : vector<8x512xf32>
    %78 = tpu.matmul %77, %6, %cst_34 {dimension_numbers = #tpu.dot_dimension_numbers<[1], [0], [0], [1], [0, 0, 1, 1], [], []>} : vector<8x128xbf16>, vector<128x512xbf16>, vector<8x512xf32> -> vector<8x512xf32>
    %79 = arith.addf %76, %78 : vector<8x512xf32>
    %80 = vector.broadcast %8 : vector<1x512xf32> to vector<8x512xf32>
    %81 = arith.addf %79, %80 : vector<8x512xf32>
    %82 = vector.extract_strided_slice %81 {offsets = [0, 0], sizes = [8, 128], strides = [1, 1]} : vector<8x512xf32> to vector<8x128xf32>
    %83 = arith.negf %82 : vector<8x128xf32>
    %84 = math.exp %83 : vector<8x128xf32>
    %cst_35 = arith.constant 1.000000e+00 : f32
    %85 = vector.broadcast %cst_35 : f32 to vector<8x128xf32>
    %86 = arith.addf %85, %84 : vector<8x128xf32>
    %87 = arith.divf %85, %86 : vector<8x128xf32>
    %88 = vector.extract_strided_slice %81 {offsets = [0, 128], sizes = [8, 128], strides = [1, 1]} : vector<8x512xf32> to vector<8x128xf32>
    %89 = arith.negf %88 : vector<8x128xf32>
    %90 = math.exp %89 : vector<8x128xf32>
    %cst_36 = arith.constant 1.000000e+00 : f32
    %91 = vector.broadcast %cst_36 : f32 to vector<8x128xf32>
    %92 = arith.addf %91, %90 : vector<8x128xf32>
    %93 = arith.divf %91, %92 : vector<8x128xf32>
    %94 = vector.extract_strided_slice %81 {offsets = [0, 256], sizes = [8, 128], strides = [1, 1]} : vector<8x512xf32> to vector<8x128xf32>
    %95 = math.tanh %94 : vector<8x128xf32>
    %96 = vector.extract_strided_slice %81 {offsets = [0, 384], sizes = [8, 128], strides = [1, 1]} : vector<8x512xf32> to vector<8x128xf32>
    %97 = arith.negf %96 : vector<8x128xf32>
    %98 = math.exp %97 : vector<8x128xf32>
    %cst_37 = arith.constant 1.000000e+00 : f32
    %99 = vector.broadcast %cst_37 : f32 to vector<8x128xf32>
    %100 = arith.addf %99, %98 : vector<8x128xf32>
    %101 = arith.divf %99, %100 : vector<8x128xf32>
    %102 = arith.mulf %93, %60 : vector<8x128xf32>
    %103 = arith.mulf %87, %95 : vector<8x128xf32>
    %104 = arith.addf %102, %103 : vector<8x128xf32>
    %105 = math.tanh %104 : vector<8x128xf32>
    %106 = arith.mulf %101, %105 : vector<8x128xf32>
    %107 = arith.subf %106, %56 : vector<8x128xf32>
    %108 = vector.broadcast %75 : vector<8x1xf32> to vector<8x128xf32>
    %109 = arith.mulf %108, %107 : vector<8x128xf32>
    %110 = arith.addf %56, %109 : vector<8x128xf32>
    %111 = arith.subf %104, %60 : vector<8x128xf32>
    %112 = vector.broadcast %75 : vector<8x1xf32> to vector<8x128xf32>
    %113 = arith.mulf %112, %111 : vector<8x128xf32>
    %114 = arith.addf %60, %113 : vector<8x128xf32>
    %c0_38 = arith.constant 0 : index
    %115 = arith.index_cast %69 : i32 to index
    %c0_39 = arith.constant 0 : index
    %c0_40 = arith.constant 0 : index
    %116 = vector.load %arg7[%c0_38, %115, %c0_39, %c0_40] : memref<1x4x8x128xf32, #tpu.memory_space<vmem>>, vector<1x1x8x128xf32>
    %117 = vector.shape_cast %116 : vector<1x1x8x128xf32> to vector<8x128xf32>
    %118 = vector.shape_cast %110 : vector<8x128xf32> to vector<1x1x8x128xf32>
    tpu.vector_store %arg7[%c0_38, %115, %c0_39, %c0_40], %118 {strides = array<i32>} : memref<1x4x8x128xf32, #tpu.memory_space<vmem>>, vector<1x1x8x128xf32>,
    %c2_i32_41 = arith.constant 2 : i32
    %c2_i32_42 = arith.constant 2 : i32
    %119 = arith.muli %c2_i32_42, %arg0 : i32
    %c1_i32_43 = arith.constant 1 : i32
    %120 = arith.subi %c1_i32_43, %119 : i32
    %121 = arith.muli %c2_i32_41, %120 : i32
    %c3_i32_44 = arith.constant 3 : i32
    %122 = arith.muli %arg0, %c3_i32_44 : i32
    %123 = arith.addi %121, %122 : i32
    %124 = arith.index_cast %123 : i32 to index
    %c0_45 = arith.constant 0 : index
    %c0_46 = arith.constant 0 : index
    %125 = vector.load %arg2[%124, %c0_45, %c0_46] : memref<4x8x16xbf16, #tpu.memory_space<vmem>>, vector<1x8x16xbf16>
    %126 = vector.shape_cast %125 : vector<1x8x16xbf16> to vector<8x16xbf16>
    %127 = arith.index_cast %123 : i32 to index
    %c0_47 = arith.constant 0 : index
    %c0_48 = arith.constant 0 : index
    %128 = vector.load %arg3[%127, %c0_47, %c0_48] : memref<4x8x1xf32, #tpu.memory_space<vmem>>, vector<1x8x1xf32>
    %129 = vector.shape_cast %128 : vector<1x8x1xf32> to vector<8x1xf32>
    %cst_49 = arith.constant dense<0.000000e+00> : vector<8x512xf32>
    %130 = tpu.matmul %126, %4, %cst_49 {dimension_numbers = #tpu.dot_dimension_numbers<[1], [0], [0], [1], [0, 0, 1, 1], [], []>} : vector<8x16xbf16>, vector<16x512xbf16>, vector<8x512xf32> -> vector<8x512xf32>
    %131 = arith.truncf %110 : vector<8x128xf32> to vector<8x128xbf16>
    %cst_50 = arith.constant dense<0.000000e+00> : vector<8x512xf32>
    %132 = tpu.matmul %131, %6, %cst_50 {dimension_numbers = #tpu.dot_dimension_numbers<[1], [0], [0], [1], [0, 0, 1, 1], [], []>} : vector<8x128xbf16>, vector<128x512xbf16>, vector<8x512xf32> -> vector<8x512xf32>
    %133 = arith.addf %130, %132 : vector<8x512xf32>
    %134 = vector.broadcast %8 : vector<1x512xf32> to vector<8x512xf32>
    %135 = arith.addf %133, %134 : vector<8x512xf32>
    %136 = vector.extract_strided_slice %135 {offsets = [0, 0], sizes = [8, 128], strides = [1, 1]} : vector<8x512xf32> to vector<8x128xf32>
    %137 = arith.negf %136 : vector<8x128xf32>
    %138 = math.exp %137 : vector<8x128xf32>
    %cst_51 = arith.constant 1.000000e+00 : f32
    %139 = vector.broadcast %cst_51 : f32 to vector<8x128xf32>
    %140 = arith.addf %139, %138 : vector<8x128xf32>
    %141 = arith.divf %139, %140 : vector<8x128xf32>
    %142 = vector.extract_strided_slice %135 {offsets = [0, 128], sizes = [8, 128], strides = [1, 1]} : vector<8x512xf32> to vector<8x128xf32>
    %143 = arith.negf %142 : vector<8x128xf32>
    %144 = math.exp %143 : vector<8x128xf32>
    %cst_52 = arith.constant 1.000000e+00 : f32
    %145 = vector.broadcast %cst_52 : f32 to vector<8x128xf32>
    %146 = arith.addf %145, %144 : vector<8x128xf32>
    %147 = arith.divf %145, %146 : vector<8x128xf32>
    %148 = vector.extract_strided_slice %135 {offsets = [0, 256], sizes = [8, 128], strides = [1, 1]} : vector<8x512xf32> to vector<8x128xf32>
    %149 = math.tanh %148 : vector<8x128xf32>
    %150 = vector.extract_strided_slice %135 {offsets = [0, 384], sizes = [8, 128], strides = [1, 1]} : vector<8x512xf32> to vector<8x128xf32>
    %151 = arith.negf %150 : vector<8x128xf32>
    %152 = math.exp %151 : vector<8x128xf32>
    %cst_53 = arith.constant 1.000000e+00 : f32
    %153 = vector.broadcast %cst_53 : f32 to vector<8x128xf32>
    %154 = arith.addf %153, %152 : vector<8x128xf32>
    %155 = arith.divf %153, %154 : vector<8x128xf32>
    %156 = arith.mulf %147, %114 : vector<8x128xf32>
    %157 = arith.mulf %141, %149 : vector<8x128xf32>
    %158 = arith.addf %156, %157 : vector<8x128xf32>
    %159 = math.tanh %158 : vector<8x128xf32>
    %160 = arith.mulf %155, %159 : vector<8x128xf32>
    %161 = arith.subf %160, %110 : vector<8x128xf32>
    %162 = vector.broadcast %129 : vector<8x1xf32> to vector<8x128xf32>
    %163 = arith.mulf %162, %161 : vector<8x128xf32>
    %164 = arith.addf %110, %163 : vector<8x128xf32>
    %165 = arith.subf %158, %114 : vector<8x128xf32>
    %166 = vector.broadcast %129 : vector<8x1xf32> to vector<8x128xf32>
    %167 = arith.mulf %166, %165 : vector<8x128xf32>
    %168 = arith.addf %114, %167 : vector<8x128xf32>
    %c0_54 = arith.constant 0 : index
    %169 = arith.index_cast %123 : i32 to index
    %c0_55 = arith.constant 0 : index
    %c0_56 = arith.constant 0 : index
    %170 = vector.load %arg7[%c0_54, %169, %c0_55, %c0_56] : memref<1x4x8x128xf32, #tpu.memory_space<vmem>>, vector<1x1x8x128xf32>
    %171 = vector.shape_cast %170 : vector<1x1x8x128xf32> to vector<8x128xf32>
    %172 = vector.shape_cast %164 : vector<8x128xf32> to vector<1x1x8x128xf32>
    tpu.vector_store %arg7[%c0_54, %169, %c0_55, %c0_56], %172 {strides = array<i32>} : memref<1x4x8x128xf32, #tpu.memory_space<vmem>>, vector<1x1x8x128xf32>,
    %c3_i32_57 = arith.constant 3 : i32
    %c2_i32_58 = arith.constant 2 : i32
    %173 = arith.muli %c2_i32_58, %arg0 : i32
    %c1_i32_59 = arith.constant 1 : i32
    %174 = arith.subi %c1_i32_59, %173 : i32
    %175 = arith.muli %c3_i32_57, %174 : i32
    %c3_i32_60 = arith.constant 3 : i32
    %176 = arith.muli %arg0, %c3_i32_60 : i32
    %177 = arith.addi %175, %176 : i32
    %178 = arith.index_cast %177 : i32 to index
    %c0_61 = arith.constant 0 : index
    %c0_62 = arith.constant 0 : index
    %179 = vector.load %arg2[%178, %c0_61, %c0_62] : memref<4x8x16xbf16, #tpu.memory_space<vmem>>, vector<1x8x16xbf16>
    %180 = vector.shape_cast %179 : vector<1x8x16xbf16> to vector<8x16xbf16>
    %181 = arith.index_cast %177 : i32 to index
    %c0_63 = arith.constant 0 : index
    %c0_64 = arith.constant 0 : index
    %182 = vector.load %arg3[%181, %c0_63, %c0_64] : memref<4x8x1xf32, #tpu.memory_space<vmem>>, vector<1x8x1xf32>
    %183 = vector.shape_cast %182 : vector<1x8x1xf32> to vector<8x1xf32>
    %cst_65 = arith.constant dense<0.000000e+00> : vector<8x512xf32>
    %184 = tpu.matmul %180, %4, %cst_65 {dimension_numbers = #tpu.dot_dimension_numbers<[1], [0], [0], [1], [0, 0, 1, 1], [], []>} : vector<8x16xbf16>, vector<16x512xbf16>, vector<8x512xf32> -> vector<8x512xf32>
    %185 = arith.truncf %164 : vector<8x128xf32> to vector<8x128xbf16>
    %cst_66 = arith.constant dense<0.000000e+00> : vector<8x512xf32>
    %186 = tpu.matmul %185, %6, %cst_66 {dimension_numbers = #tpu.dot_dimension_numbers<[1], [0], [0], [1], [0, 0, 1, 1], [], []>} : vector<8x128xbf16>, vector<128x512xbf16>, vector<8x512xf32> -> vector<8x512xf32>
    %187 = arith.addf %184, %186 : vector<8x512xf32>
    %188 = vector.broadcast %8 : vector<1x512xf32> to vector<8x512xf32>
    %189 = arith.addf %187, %188 : vector<8x512xf32>
    %190 = vector.extract_strided_slice %189 {offsets = [0, 0], sizes = [8, 128], strides = [1, 1]} : vector<8x512xf32> to vector<8x128xf32>
    %191 = arith.negf %190 : vector<8x128xf32>
    %192 = math.exp %191 : vector<8x128xf32>
    %cst_67 = arith.constant 1.000000e+00 : f32
    %193 = vector.broadcast %cst_67 : f32 to vector<8x128xf32>
    %194 = arith.addf %193, %192 : vector<8x128xf32>
    %195 = arith.divf %193, %194 : vector<8x128xf32>
    %196 = vector.extract_strided_slice %189 {offsets = [0, 128], sizes = [8, 128], strides = [1, 1]} : vector<8x512xf32> to vector<8x128xf32>
    %197 = arith.negf %196 : vector<8x128xf32>
    %198 = math.exp %197 : vector<8x128xf32>
    %cst_68 = arith.constant 1.000000e+00 : f32
    %199 = vector.broadcast %cst_68 : f32 to vector<8x128xf32>
    %200 = arith.addf %199, %198 : vector<8x128xf32>
    %201 = arith.divf %199, %200 : vector<8x128xf32>
    %202 = vector.extract_strided_slice %189 {offsets = [0, 256], sizes = [8, 128], strides = [1, 1]} : vector<8x512xf32> to vector<8x128xf32>
    %203 = math.tanh %202 : vector<8x128xf32>
    %204 = vector.extract_strided_slice %189 {offsets = [0, 384], sizes = [8, 128], strides = [1, 1]} : vector<8x512xf32> to vector<8x128xf32>
    %205 = arith.negf %204 : vector<8x128xf32>
    %206 = math.exp %205 : vector<8x128xf32>
    %cst_69 = arith.constant 1.000000e+00 : f32
    %207 = vector.broadcast %cst_69 : f32 to vector<8x128xf32>
    %208 = arith.addf %207, %206 : vector<8x128xf32>
    %209 = arith.divf %207, %208 : vector<8x128xf32>
    %210 = arith.mulf %201, %168 : vector<8x128xf32>
    %211 = arith.mulf %195, %203 : vector<8x128xf32>
    %212 = arith.addf %210, %211 : vector<8x128xf32>
    %213 = math.tanh %212 : vector<8x128xf32>
    %214 = arith.mulf %209, %213 : vector<8x128xf32>
    %215 = arith.subf %214, %164 : vector<8x128xf32>
    %216 = vector.broadcast %183 : vector<8x1xf32> to vector<8x128xf32>
    %217 = arith.mulf %216, %215 : vector<8x128xf32>
    %218 = arith.addf %164, %217 : vector<8x128xf32>
    %219 = arith.subf %212, %168 : vector<8x128xf32>
    %220 = vector.broadcast %183 : vector<8x1xf32> to vector<8x128xf32>
    %221 = arith.mulf %220, %219 : vector<8x128xf32>
    %222 = arith.addf %168, %221 : vector<8x128xf32>
    %c0_70 = arith.constant 0 : index
    %223 = arith.index_cast %177 : i32 to index
    %c0_71 = arith.constant 0 : index
    %c0_72 = arith.constant 0 : index
    %224 = vector.load %arg7[%c0_70, %223, %c0_71, %c0_72] : memref<1x4x8x128xf32, #tpu.memory_space<vmem>>, vector<1x1x8x128xf32>
    %225 = vector.shape_cast %224 : vector<1x1x8x128xf32> to vector<8x128xf32>
    %226 = vector.shape_cast %218 : vector<8x128xf32> to vector<1x1x8x128xf32>
    tpu.vector_store %arg7[%c0_70, %223, %c0_71, %c0_72], %226 {strides = array<i32>} : memref<1x4x8x128xf32, #tpu.memory_space<vmem>>, vector<1x1x8x128xf32>,
    %c4_i32 = arith.constant 4 : i32
    %c0_73 = arith.constant 0 : index
    %c0_74 = arith.constant 0 : index
    %227 = vector.load %arg8[%c0_73, %c0_74] : memref<8x128xf32, #tpu.memory_space<vmem>>, vector<8x128xf32>
    tpu.vector_store %arg8[%c0_73, %c0_74], %218 {strides = array<i32>} : memref<8x128xf32, #tpu.memory_space<vmem>>, vector<8x128xf32>,
    %c0_75 = arith.constant 0 : index
    %c0_76 = arith.constant 0 : index
    %228 = vector.load %arg9[%c0_75, %c0_76] : memref<8x128xf32, #tpu.memory_space<vmem>>, vector<8x128xf32>
    tpu.vector_store %arg9[%c0_75, %c0_76], %222 {strides = array<i32>} : memref<8x128xf32, #tpu.memory_space<vmem>>, vector<8x128xf32>,
    return
  }
  func.func @transform_0(%arg0: i32, %arg1: i32) -> (i32, i32, i32) {
    %c2_i32 = arith.constant 2 : i32
    %0 = arith.muli %c2_i32, %arg0 : i32
    %c1_i32 = arith.constant 1 : i32
    %1 = arith.subi %c1_i32, %0 : i32
    %2 = arith.muli %arg1, %1 : i32
    %c0_i32 = arith.constant 0 : i32
    %3 = arith.muli %arg0, %c0_i32 : i32
    %4 = arith.addi %2, %3 : i32
    %c0_i32_0 = arith.constant 0 : i32
    %c0_i32_1 = arith.constant 0 : i32
    %c0_i32_2 = arith.constant 0 : i32
    return %4, %c0_i32_0, %c0_i32_1 : i32, i32, i32
  }
  func.func @transform_1(%arg0: i32, %arg1: i32) -> (i32, i32, i32) {
    %c2_i32 = arith.constant 2 : i32
    %0 = arith.muli %c2_i32, %arg0 : i32
    %c1_i32 = arith.constant 1 : i32
    %1 = arith.subi %c1_i32, %0 : i32
    %2 = arith.muli %arg1, %1 : i32
    %c0_i32 = arith.constant 0 : i32
    %3 = arith.muli %arg0, %c0_i32 : i32
    %4 = arith.addi %2, %3 : i32
    %c0_i32_0 = arith.constant 0 : i32
    %c0_i32_1 = arith.constant 0 : i32
    %c0_i32_2 = arith.constant 0 : i32
    return %4, %c0_i32_0, %c0_i32_1 : i32, i32, i32
  }
  func.func @transform_2(%arg0: i32, %arg1: i32) -> (i32, i32, i32) {
    %c0_i32 = arith.constant 0 : i32
    %c0_i32_0 = arith.constant 0 : i32
    %c0_i32_1 = arith.constant 0 : i32
    return %arg0, %c0_i32, %c0_i32_0 : i32, i32, i32
  }
  func.func @transform_3(%arg0: i32, %arg1: i32) -> (i32, i32, i32) {
    %c0_i32 = arith.constant 0 : i32
    %c0_i32_0 = arith.constant 0 : i32
    %c0_i32_1 = arith.constant 0 : i32
    return %arg0, %c0_i32, %c0_i32_0 : i32, i32, i32
  }
  func.func @transform_4(%arg0: i32, %arg1: i32) -> (i32, i32, i32) {
    %c0_i32 = arith.constant 0 : i32
    %c0_i32_0 = arith.constant 0 : i32
    %c0_i32_1 = arith.constant 0 : i32
    return %arg0, %c0_i32, %c0_i32_0 : i32, i32, i32
  }
  func.func @transform_5(%arg0: i32, %arg1: i32) -> (i32, i32, i32, i32) {
    %c2_i32 = arith.constant 2 : i32
    %0 = arith.muli %c2_i32, %arg0 : i32
    %c1_i32 = arith.constant 1 : i32
    %1 = arith.subi %c1_i32, %0 : i32
    %2 = arith.muli %arg1, %1 : i32
    %c0_i32 = arith.constant 0 : i32
    %3 = arith.muli %arg0, %c0_i32 : i32
    %4 = arith.addi %2, %3 : i32
    %c0_i32_0 = arith.constant 0 : i32
    %c0_i32_1 = arith.constant 0 : i32
    %c0_i32_2 = arith.constant 0 : i32
    return %arg0, %4, %c0_i32_0, %c0_i32_1 : i32, i32, i32, i32
  }
}

</mosaic_0001>

<bundles_post_ra>
// kernel: tpu_custom_call.1
= control target key start
LH: loop header
LB: loop body
LE: loop exit
PB: predicated region body
PF: predicated region fallthrough
CT: control target
= control target key end

     0   :  { %s2875_s0 = inlined_call_operand.vmem [shape: bf16[4,8,16], index: 0, kind: input, shape index: {}]   ;;  %s2876_s1 = inlined_call_operand.vmem [shape: f32[4,8,1], index: 1, kind: input, shape index: {}]   ;;  %s2877_s2 = inlined_call_operand.hbm [shape: bf16[2,16,512], index: 2, kind: input, shape index: {}]   ;;  %s2878_s3 = inlined_call_operand.hbm [shape: bf16[2,128,512], index: 3, kind: input, shape index: {}]   ;;  %s2879_s4 = inlined_call_operand.vmem [shape: f32[2,1,512], index: 4, kind: input, shape index: {}]   ;;  %s2880_s5 = inlined_call_operand.hbm [shape: f32[2,4,8,128], index: 5, kind: output, shape index: {}]  }
   0x1   :  { %2888 = sst [smem:[#allocation14_spill]] %s2877_s2 }
   0x2   :  { %10 = vsyncpa [#allocation5], 0 }
   0x3   :  { %12 = vsyncpa [#allocation5 + $0x1], 0 }
   0x4   :  { %13 = vsyncpa [#allocation8], 0 }
   0x5   :  { %15 = vsyncpa [#allocation8 + $0x1], 0 }
   0x6   :  { %16 = vsyncpa [#allocation6], 0 }
   0x7   :  { %18 = vsyncpa [#allocation6 + $0x1], 0  ;;  %s2219_s18 = smov 0   ;;  %s2221_s19 = smov 0  }
   0x8   :  { %s2223_s20 = smov 0   ;;  %s2225_s21 = smov 0  }
   0x9   :  { %s2227_s22 = smov 0   ;;  %s2229_s23 = smov 0  }
   0xa LB: > { %s1738_s24 = sadd.s32 4294967295, %s2178_s23   ;;  %s1739_s25 = sadd.s32 4294967294, %s2178_s23   ;;  %s2178_s23 = sphi %s2229_s23, %s24_s23   ;;  %s2174_s22 = sphi %s2227_s22, %s2910_s22   ;;  %s2170_s21 = sphi %s2225_s21, %s2909_s21   ;;  %s2166_s20 = sphi %s2223_s20, %s2908_s20   ;;  %s2162_s19 = sphi %s2221_s19, %s2907_s19   ;;  %s2158_s18 = sphi %s2219_s18, %s2906_s18  }
   0xb   : > { %s36_s26 = sadd.s32 1, %s2174_s22  ;;  %s107_s27 = sadd.s32 1, %s2166_s20 }
   0xc   : > { %p38_p0 = scmp.ge.s32.totalorder %s36_s26, 2  ;;  %p114_p1 = scmp.ne.s32.totalorder %s2166_s20, %s2162_s19 }
   0xd   : > { %p115_p2 = scmp.eq.s32.totalorder %s2178_s23, 0  ;;  %p120_p3 = scmp.ne.s32.totalorder %s2162_s19, %s2158_s18 }
   0xe   : > { %s2912_s26 = smov (%p38_p0, %s36_s26), 0  ;;  %p121_p5 = scmp.eq.s32.totalorder %s1738_s24, 0 }
   0xf   : > { %p2260_p4 = por %p115_p2, %p114_p1  ;;  %s104_s29 = ssub.s32 %s2174_s22, %s2912_s26 }
  0x10   : > { %p204_p6 = scmp.eq.s32.totalorder %s1738_s24, 1  ;;  %p105_p7 = scmp.eq.s32.totalorder %s104_s29, 0 }
  0x11   : > { %p2266_p8 = por %p121_p5, %p120_p3  ;;  %p210_p10 = scmp.eq.s32.totalorder %s1739_s25, 1 }
  0x12   : > { %p2270_p9 = por %p204_p6, %p114_p1  ;;  %p1856_p13 = scmp.lt.s32.totalorder %s2178_s23, 2 }
  0x13   : > { %s2890_s30 = scalar_select %p2266_p8, 1, 0 }
  0x14   : > { %s2891_s6 = scalar_select %p2270_p9, 1, 0 }
  0x15   : > { %s2275_s7 = scalar_select %p105_p7, %s2166_s20, %s107_s27  }
  0x16   : > { %p2277_p11 = por %p210_p10, %p120_p3  ;;  %s2284_s9 = sand.u32 1, %s2166_s20  }
  0x17   : > { %s1750_s10 = sshll.u32 %s2284_s9, 5  ;;  %s1835_s11 = sshll.u32 %s2174_s22, 9 }
  0x18   : > { %s2892_s8 = scalar_select %p2277_p11, 1, 0 }
  0x19   : > { %s2893_s2 = sld [smem:[#allocation14_spill]]  ;;  %s264_s15 = scalar_lea.vmem [#allocation4], %s1750_s10 }
  0x1a   : > { %s271_s16 = sshll.u32 %s264_s15, 4  ;;  %p2297_p0 = pnand %p1856_p13, %p2260_p4  ;;  %s2293_s16 = int_to_ptr.vmem [resolvable:$true] %s271_s16 }
  0x1b   : > { %s261_s24 = scalar_lea.sflag [#allocation5], %s2284_s9 }
  0x1c   : > { %p2034_p3 = pneg %p2297_p0 }
  0x1f   : > { %s2291_s14 = scalar_lea.hbm %s2893_s2, %s1835_s11  ;;  %s2037_s28 = scalar_lea.hbm %s2893_s2, 1024 }
  0x20   : > { %s2032_s25 = scalar_lea.hbm %s2291_s14, 512  ;;  %p2038_p4 = scmp.lt.u32.totalorder %s2291_s14, %s2893_s2 }
  0x21   : > { %p2033_p2 = scmp.ne.s32.totalorder %s2291_s14, %s2032_s25  ;;  %p2039_p7 = scmp.lt.u32.totalorder %s2037_s28, %s2032_s25 }
  0x22   : > { %p2041_p13 = scmp.lt.u32.totalorder %s2032_s25, %s2291_s14 }
  0x23   : > { %p2035_p5 = pnand %p2034_p3, %p2033_p2  ;;  %p2040_p10 = por %p2039_p7, %p2038_p4 }
  0x25   : > { %p2036_p6 = pneg %p2035_p5  ;;  %p2042_p12 = por %p2041_p13, %p2040_p10 }
  0x27   : > { %p2043_p1 = pnand %p2042_p12, %p2036_p6 }
  0x29   : > { %2046 = shalt.err (!%p2043_p1)
}
  0x2a   : > { %s2047_s12 = scalar_lea.vmem %s2293_s16, 512  ;;  %s2180_s13 = smov [#allocation4]  }
  0x2b   : > { %p2048_p2 = scmp.ne.s32.totalorder %s2293_s16, %s2047_s12  ;;  %s2052_s15 = sshll.u32 %s2180_s13, 4  ;;  %s2053_s15 = int_to_ptr.vmem [resolvable:$false] %s2052_s15 }
  0x2c   : > { %s2054_s27 = scalar_lea.vmem %s2053_s15, 1024  ;;  %p2055_p9 = scmp.lt.s32.totalorder %s2293_s16, %s2053_s15 }
  0x2d   : > { %p2050_p5 = pnand %p2048_p2, %p2034_p3  ;;  %p2056_p4 = scmp.lt.s32.totalorder %s2054_s27, %s2047_s12 }
  0x2f   : > { %p2051_p11 = pneg %p2050_p5  ;;  %p2057_p7 = por %p2056_p4, %p2055_p9 }
  0x31   : > { %p2058_p10 = pnand %p2057_p7, %p2051_p11 }
  0x33   : > { %2061 = shalt.err (!%p2058_p10)
}
  0x34   : > { %s2882_s25 = smov 256   ;;  %s2182_s29 = smov 16  }
  0x35   : > { %1848 = dma.hbm_to_vmem [thread:$0]  (!%p2297_p0), %s2291_s14, 512, %s2293_s16, %s261_s24, %s2882_s25, %s2882_s25, %s2182_s29  }
  0x36   : > { %p307_p9 = scmp.lt.s32.totalorder %s2178_s23, 3  ;;  %s1753_s28 = sshll.u32 %s2284_s9, 8 }
  0x37   : > { %s1836_s10 = sshll.u32 %s2174_s22, 12  ;;  %p2895_p11 = scmp.ge.s32.totalorder %s2178_s23, 1 }
  0x38   : > { %s2345_s15 = scalar_lea.hbm %s2878_s3, %s1836_s10  ;;  %s285_s27 = scalar_lea.vmem [#allocation7], %s1753_s28 }
  0x39   : > { %p2338_p12 = pnand %p2895_p11, %p307_p9  ;;  %s292_s2 = sshll.u32 %s285_s27, 4  ;;  %s2347_s2 = int_to_ptr.vmem [resolvable:$true] %s292_s2 }
  0x3a   : > { %s282_s14 = scalar_lea.sflag [#allocation8], %s2284_s9  ;;  %s2062_s16 = scalar_lea.hbm %s2345_s15, 4096 }
  0x3b   : > { %p2063_p1 = scmp.ne.s32.totalorder %s2345_s15, %s2062_s16  ;;  %s2067_s10 = scalar_lea.hbm %s2878_s3, 8192 }
  0x3c   : > { %p2068_p2 = scmp.lt.u32.totalorder %s2345_s15, %s2878_s3  ;;  %p2069_p5 = scmp.lt.u32.totalorder %s2067_s10, %s2062_s16 }
  0x3d   : > { %p2065_p6 = pnand %p2063_p1, %p2034_p3  ;;  %p2071_p7 = scmp.lt.u32.totalorder %s2062_s16, %s2345_s15 }
  0x3e   : > { %p2070_p4 = por %p2069_p5, %p2068_p2 }
  0x3f   : > { %p2066_p13 = pneg %p2065_p6 }
  0x40   : > { %p2072_p10 = por %p2071_p7, %p2070_p4 }
  0x42   : > { %p2073_p9 = pnand %p2072_p10, %p2066_p13 }
  0x44   : > { %2076 = shalt.err (!%p2073_p9)
}
  0x45   : > { %s2077_s28 = scalar_lea.vmem %s2347_s2, 4096  ;;  %s2183_s25 = smov [#allocation7]  }
  0x46   : > { %p2078_p11 = scmp.ne.s32.totalorder %s2347_s2, %s2077_s28  ;;  %s2082_s27 = sshll.u32 %s2183_s25, 4  ;;  %s2083_s27 = int_to_ptr.vmem [resolvable:$false] %s2082_s27 }
  0x47   : > { %s2084_s24 = scalar_lea.vmem %s2083_s27, 8192  ;;  %p2085_p8 = scmp.lt.s32.totalorder %s2347_s2, %s2083_s27 }
  0x48   : > { %p2080_p1 = pnand %p2078_p11, %p2034_p3  ;;  %p2086_p2 = scmp.lt.s32.totalorder %s2084_s24, %s2077_s28 }
  0x4a   : > { %p2081_p6 = pneg %p2080_p1  ;;  %p2087_p5 = por %p2086_p2, %p2085_p8 }
  0x4c   : > { %p2088_p4 = pnand %p2087_p5, %p2081_p6 }
  0x4e   : > { %2091 = shalt.err (!%p2088_p4)
}
  0x4f   : > { %s2897_s16 = smov 256   ;;  %311 = sbr.rel (%p2338_p12) target bundleno = 1241 (0x4d9), region = 40 }
  0x50   : > { %1851 = dma.hbm_to_vmem [thread:$0]  (!%p2297_p0), %s2345_s15, 4096, %s2347_s2, %s282_s14, %s2897_s16, %s2897_s16, %s2182_s29  }
  0x56   : > { %s2381_s10 = sand.u32 1, %s2162_s19   ;;  %p2898_p8 = scmp.ne.s32.totalorder %s2890_s30, 0 }
  0x57   : > { %s1757_s12 = sshll.u32 %s2381_s10, 5  ;;  %s314_s17 = scalar_lea.sflag [#allocation5], %s2381_s10 }
  0x58   : > { %s2387_s13 = scalar_lea.vmem [#allocation4], %s1757_s12 }
  0x59   : > { %2145 = dma.done.wait (%p2898_p8), %s314_s17, 512  }
  0x5a   : > { %2147 = vsyncadd (%p2898_p8), %s314_s17, 4294966784  ;;  %s1758_s2 = sshll.u32 %s2381_s10, 8  ;;  %s323_s9 = scalar_lea.sflag [#allocation8], %s2381_s10 }
  0x5b   : > { %s2395_s29 = scalar_lea.vmem [#allocation7], %s1758_s2 }
  0x5c   : > { %2149 = dma.done.wait (%p2898_p8), %s323_s9, 4096  }
  0x5d   : > { %2151 = vsyncadd (%p2898_p8), %s323_s9, 4294963200  ;;  %v2885_v0 = vmov 0   ;;  %v2406_v1 = vld [vmem:[%s2395_s29 + $0x4] ss:$16 sps:$4 sm:$0xff]   ;;  %v2409_v2 = vld [vmem:[%s2395_s29] ss:$16 sps:$4 sm:$0xff]   ;;  %v813_v41 = vlaneseq }
  0x5e   : > { %656 = vmatprep.mubr.bf16.mxu0 %v2885_v0  ;;  %697 = vmatprep.mubr.bf16.mxu1 %v2885_v0  ;;  %v2413_v3 = vld [vmem:[%s2395_s29 + $0x24] ss:$16 sps:$4 sm:$0xff]   ;;  %v2416_v4 = vld [vmem:[%s2395_s29 + $0x20] ss:$16 sps:$4 sm:$0xff]   ;;  %v2420_v5 = vld [vmem:[%s2395_s29 + $0xc] ss:$16 sps:$4 sm:$0xff]  }
  0x5f   : > { %1912 = vset.pattern.permute.xlu0 %v2885_v0  ;;  %1913 = vset.pattern.permute.xlu1 %v2885_v0  ;;  %v2424_v6 = vld [vmem:[%s2395_s29 + $0x44] ss:$16 sps:$4 sm:$0xff]   ;;  %v2427_v7 = vld [vmem:[%s2395_s29 + $0x8] ss:$16 sps:$4 sm:$0xff]   ;;  %v2432_v8 = vld [vmem:[%s2395_s29 + $0x2c] ss:$16 sps:$4 sm:$0xff]  }
  0x60   : > { %624 = vmatprep.subr.bf16.mxu0 %v2406_v1  ;;  %665 = vmatprep.subr.bf16.mxu1 %v2420_v5  ;;  %v2436_v9 = vld [vmem:[%s2395_s29 + $0x40] ss:$16 sps:$4 sm:$0xff]   ;;  %v2439_v10 = vld [vmem:[%s2395_s29 + $0x64] ss:$16 sps:$4 sm:$0xff]   ;;  %v2442_v11 = vld [vmem:[%s2395_s29 + $0x28] ss:$16 sps:$4 sm:$0xff]  }
  0x61   : > { %625 = vmatpush1.bf16.msra.mxu0 %v2409_v2  ;;  %666 = vmatpush1.bf16.msra.mxu1 %v2427_v7  ;;  %v2447_v12 = vld [vmem:[%s2395_s29 + $0x4c] ss:$16 sps:$4 sm:$0xff]   ;;  %v2451_v13 = vld [vmem:[%s2395_s29 + $0x60] ss:$16 sps:$4 sm:$0xff]   ;;  %v2454_v14 = vld [vmem:[%s2395_s29 + $0x48] ss:$16 sps:$4 sm:$0xff]  }
  0x62   : > { %626 = vmatprep.subr.bf16.mxu0 %v2413_v3  ;;  %667 = vmatprep.subr.bf16.mxu1 %v2432_v8  ;;  %v2459_v15 = vld [vmem:[%s2395_s29 + $0x6c] ss:$16 sps:$4 sm:$0xff]   ;;  %s1806_s30 = sshll.u32 %s2170_s21, 1  ;;  %v2464_v16 = vld [vmem:[%s2395_s29 + $0x84] ss:$16 sps:$4 sm:$0xff]   ;;  %s2467_s11 = smul.u32 3, %s2170_s21 }
  0x63   : > { %v2471_v17 = vld [vmem:[%s2395_s29 + $0x68] ss:$16 sps:$4 sm:$0xff]   ;;  %s2473_s15 = ssub.s32 1, %s1806_s30  ;;  %v2477_v18 = vld [vmem:[%s2395_s29 + $0x80] ss:$16 sps:$4 sm:$0xff]   ;;  %s1764_s14 = smul.u32 24, %s2170_s21 }
  0x64   : > { %v2481_v19 = vld [vmem:[%s2395_s29 + $0x8c] ss:$16 sps:$4 sm:$0xff]   ;;  %v2485_v20 = vld [vmem:[%s2395_s29 + $0xa4] ss:$16 sps:$4 sm:$0xff]   ;;  %s2490_s28 = sadd.s32 %s2473_s15, %s2467_s11  ;;  %v2494_v21 = vld [vmem:[%s2395_s29 + $0x88] ss:$16 sps:$4 sm:$0xff]  }
  0x65   : > { %627 = vmatpush1.bf16.msra.mxu0 %v2416_v4  ;;  %668 = vmatpush1.bf16.msra.mxu1 %v2442_v11  ;;  %v2498_v22 = vld [vmem:[%s2395_s29 + $0xa0] ss:$16 sps:$4 sm:$0xff]   ;;  %v2502_v23 = vld [vmem:[%s2395_s29 + $0xac] ss:$16 sps:$4 sm:$0xff]   ;;  %v2506_v24 = vld [vmem:[%s2395_s29 + $0xc4] ss:$16 sps:$4 sm:$0xff]   ;;  %s461_s16 = scalar_lea.vmem %s2876_s1, %s1764_s14 }
  0x66   : > { %628 = vmatprep.subr.bf16.mxu0 %v2424_v6  ;;  %669 = vmatprep.subr.bf16.mxu1 %v2447_v12  ;;  %s2884_s25 = sshll.u32 %s2490_s28, 3  ;;  %v2516_v25 = vld [vmem:[%s2395_s29 + $0xc0] ss:$16 sps:$4 sm:$0xff]   ;;  %v2519_v26 = vld [vmem:[%s2395_s29 + $0xa8] ss:$16 sps:$4 sm:$0xff]   ;;  %s1837_s30 = smul.u32 12, %s2170_s21 }
  0x67   : > { %v2524_v27 = vld [vmem:[%s2395_s29 + $0xcc] ss:$16 sps:$4 sm:$0xff]   ;;  %s881_s9 = scalar_lea.vmem %s2876_s1, %s2884_s25  ;;  %v2533_v28 = vld [vmem:[%s2395_s29 + $0xe4] ss:$16 sps:$4 sm:$0xff]   ;;  %v2537_v30 = vld [vmem:[%s2395_s29 + $0xc8] ss:$16 sps:$4 sm:$0xff]  }
  0x68   : > { %v462_v29 = vld [vmem:[%s461_s16] sm:$0xff]  ;;  %v2545_v33 = vld [vmem:[%s2395_s29 + $0xec] ss:$16 sps:$4 sm:$0xff]   ;;  %v2553_v35 = vld [vmem:[%s2395_s29 + $0xe8] ss:$16 sps:$4 sm:$0xff]   ;;  %v2185_v38 = vmov 0.0|0.0   ;;  %s458_s24 = scalar_lea.vmem %s2875_s0, %s1837_s30 }
  0x69   : > { %629 = vmatpush1.bf16.msra.mxu0 %v2436_v9  ;;  %670 = vmatpush1.bf16.msra.mxu1 %v2454_v14  ;;  %v882_v31 = vld [vmem:[%s881_s9] sm:$0xff]  ;;  %v2563_v37 = vld [vmem:[%s2387_s13 + $0xc] ss:$16 sps:$4 sm:$0xff]   ;;  %v2567_v39 = vld [vmem:[%s2387_s13 + $0x8] ss:$16 sps:$4 sm:$0xff]   ;;  %vm726_vm0 = vcmask 130048  }
  0x6a   : > { %630 = vmatprep.subr.bf16.mxu0 %v2439_v10  ;;  %671 = vmatprep.subr.bf16.mxu1 %v2459_v15  ;;  %v2541_v32 = vld [vmem:[%s2395_s29 + $0xe0] ss:$16 sps:$4 sm:$0xff]   ;;  %v2549_v34 = vld [vmem:[%s2387_s13 + $0x4] ss:$16 sps:$4 sm:$0xff]   ;;  %2899 = vst [vmem:[#allocation13_spill] sm:$0xff] %v2563_v37  ;;  %p402_p0 = scmp.lt.s32.totalorder %s2170_s21, 1 }
  0x6b   : > { %864 = vperm.xlu0 %1912, %v462_v29   ;;  %v2557_v36 = vld [vmem:[%s2387_s13] ss:$16 sps:$4 sm:$0xff]   ;;  %v814_v42 = vshrl.u32 %v813_v41, 7  ;;  %s2637_s30 = scalar_lea.vmem [#allocation9], %s1757_s12  ;;  %s1807_s27 = sshll.u32 %s2490_s28, 2 }
  0x6c   : > { %v459_v40 = vld [vmem:[%s458_s24] sm:$0xf]  ;;  %s403_s13 = scalar_select %p402_p0, %s2170_s21, 1 }
  0x6d   : > { %631 = vmatpush1.bf16.msra.mxu0 %v2451_v13  ;;  %672 = vmatpush1.bf16.msra.mxu1 %v2471_v17  ;;  %v815_v47 = vsub.s32 0, %v814_v42  ;;  %v819_v50 = vsub.s32 1, %v814_v42  ;;  %v827_v61 = vsub.s32 3, %v814_v42  ;;  %s872_s29 = scalar_lea.vmem %s2637_s30, %s1764_s14 [#allocation9]  ;;  %s878_s14 = scalar_lea.vmem %s2875_s0, %s1807_s27 }
  0x6e   : > { %632 = vmatprep.subr.bf16.mxu0 %v2464_v16  ;;  %673 = vmatprep.subr.bf16.mxu1 %v2481_v19  ;;  %s1762_s16 = sshll.u32 %s403_s13, 2  ;;  %s1814_s13 = sshll.u32 %s2473_s15, 1 }
  0x6f   : > { %1082 = vperm.xlu0 %1912, %v882_v31   ;;  %s405_s9 = scalar_lea.vmem %s2879_s4, %s1762_s16  ;;  %s2698_s16 = sadd.s32 %s1814_s13, %s2467_s11 }
  0x70   : > { %v453_v49 = vld [vmem:[%s405_s9] sm:$0xf]  ;;  %s1816_s17 = sshll.u32 %s2698_s16, 3  ;;  %s1309_s2 = smul.u32 3, %s2473_s15 }
  0x71   : > { %633 = vmatpush1.bf16.msra.mxu0 %v2477_v18  ;;  %674 = vmatpush1.bf16.msra.mxu1 %v2494_v21  ;;  %v2620_v54 = vrot.slane %v453_v49, %v815_v47  ;;  %v2622_v56 = vrot.slane %v453_v49, %v819_v50  ;;  %s1098_s27 = scalar_lea.vmem %s2876_s1, %s1816_s17  ;;  %p2903_p12 = scmp.ne.s32.totalorder %s2891_s6, 0 }
  0x72   : > { %634 = vmatprep.subr.bf16.mxu0 %v2485_v20  ;;  %675 = vmatprep.subr.bf16.mxu1 %v2502_v23  ;;  %s2708_s12 = sadd.s32 %s1309_s2, %s2467_s11  ;;  %s2900_s11 = sshll.u32 %s2490_s28, 3 }
  0x73   : > { %s1823_s24 = sshll.u32 %s2708_s12, 3  ;;  %s1090_s15 = scalar_lea.vmem %s2637_s30, %s2900_s11 [#allocation9] }
  0x74   : > { %s1315_s25 = scalar_lea.vmem %s2876_s1, %s1823_s24  ;;  %s1838_s11 = sshll.u32 %s2170_s21, 9 }
  0x75   : > { %635 = vmatpush1.bf16.msra.mxu0 %v2498_v22  ;;  %676 = vmatpush1.bf16.msra.mxu1 %v2519_v26  ;;  %s2825_s2 = scalar_lea.hbm %s2880_s5, %s1838_s11  ;;  %s2186_s21 = smov [#allocation9]  }
  0x76   : > { %636 = vmatprep.subr.bf16.mxu0 %v2506_v24  ;;  %677 = vmatprep.subr.bf16.mxu1 %v2524_v27 }
  0x79   : > { %637 = vmatpush1.bf16.msra.mxu0 %v2516_v25  ;;  %678 = vmatpush1.bf16.msra.mxu1 %v2537_v30 }
  0x7a   : > { %638 = vmatprep.subr.bf16.mxu0 %v2533_v28  ;;  %679 = vmatprep.subr.bf16.mxu1 %v2545_v33 }
  0x7d   : > { %639 = vmatpush1.bf16.msra.mxu0 %v2541_v32  ;;  %680 = vmatpush1.bf16.msra.mxu1 %v2553_v35 }
  0x7e   : > { %730 = vmatprep.subr.bf16.mxu0 %v2549_v34  ;;  %771 = vmatprep.subr.bf16.mxu1 %v2563_v37 }
  0x80   : > { %657 = vmatmul.mubr.bf16.vlgmr.msra.gmra.mrb[0].mxu0 %v2185_v38  ;;  %698 = vmatmul.mubr.bf16.vlgmr.msra.gmra.mrb[0].mxu1 %v2185_v38 }
  0x81   : > { %731 = vmatpush1.bf16.msra.mxu0 %v2557_v36  ;;  %762 = vmatprep.mubr.bf16.mxu0 %v2885_v0 }
  0x82   : > { %884 = vmatprep.subr.bf16.mxu0 %v2406_v1  ;;  %772 = vmatpush1.bf16.msra.mxu1 %v2567_v39 }
  0x83   : > { %803 = vmatprep.mubr.bf16.mxu1 %v2885_v0  ;;  %925 = vmatprep.subr.bf16.mxu1 %v2420_v5 }
  0x88   : > { %1801 = vmatmul.mubr.msk.bf16.vlgmr.msra.gmra.mrb[4].mxu0 %vm726_vm0, %v459_v40  ;;  %1802 = vmatmul.mubr.msk.bf16.vlgmr.msra.gmra.mrb[4].mxu1 %vm726_vm0, %v459_v40 }
  0x89   : > { %885 = vmatpush1.bf16.msra.mxu0 %v2409_v2  ;;  %916 = vmatprep.mubr.bf16.mxu0 %v2885_v0 }
  0x8a   : > { %886 = vmatprep.subr.bf16.mxu0 %v2413_v3  ;;  %926 = vmatpush1.bf16.msra.mxu1 %v2427_v7 }
  0x8b   : > { %957 = vmatprep.mubr.bf16.mxu1 %v2885_v0  ;;  %927 = vmatprep.subr.bf16.mxu1 %v2432_v8 }
  0x8d   : > { %887 = vmatpush1.bf16.msra.mxu0 %v2416_v4 }
  0x8e   : > { %888 = vmatprep.subr.bf16.mxu0 %v2424_v6  ;;  %928 = vmatpush1.bf16.msra.mxu1 %v2442_v11 }
  0x8f   : > { %929 = vmatprep.subr.bf16.mxu1 %v2447_v12 }
  0x91   : > { %889 = vmatpush1.bf16.msra.mxu0 %v2436_v9 }
  0x92   : > { %890 = vmatprep.subr.bf16.mxu0 %v2439_v10  ;;  %930 = vmatpush1.bf16.msra.mxu1 %v2454_v14 }
  0x93   : > { %931 = vmatprep.subr.bf16.mxu1 %v2459_v15 }
  0x95   : > { %891 = vmatpush1.bf16.msra.mxu0 %v2451_v13 }
  0x96   : > { %892 = vmatprep.subr.bf16.mxu0 %v2464_v16  ;;  %932 = vmatpush1.bf16.msra.mxu1 %v2471_v17 }
  0x97   : > { %933 = vmatprep.subr.bf16.mxu1 %v2481_v19 }
  0x99   : > { %893 = vmatpush1.bf16.msra.mxu0 %v2477_v18 }
  0x9a   : > { %894 = vmatprep.subr.bf16.mxu0 %v2485_v20  ;;  %934 = vmatpush1.bf16.msra.mxu1 %v2494_v21 }
  0x9b   : > { %935 = vmatprep.subr.bf16.mxu1 %v2502_v23 }
  0x9d   : > { %895 = vmatpush1.bf16.msra.mxu0 %v2498_v22 }
  0x9e   : > { %896 = vmatprep.subr.bf16.mxu0 %v2506_v24  ;;  %936 = vmatpush1.bf16.msra.mxu1 %v2519_v26 }
  0x9f   : > { %937 = vmatprep.subr.bf16.mxu1 %v2524_v27 }
  0xa1   : > { %897 = vmatpush1.bf16.msra.mxu0 %v2516_v25 }
  0xa2   : > { %898 = vmatprep.subr.bf16.mxu0 %v2533_v28  ;;  %938 = vmatpush1.bf16.msra.mxu1 %v2537_v30 }
  0xa3   : > { %939 = vmatprep.subr.bf16.mxu1 %v2545_v33 }
  0xa5   : > { %899 = vmatpush1.bf16.msra.mxu0 %v2541_v32 }
  0xa6   : > { %969 = vmatprep.subr.bf16.mxu0 %v2549_v34  ;;  %940 = vmatpush1.bf16.msra.mxu1 %v2553_v35 }
  0xa7   : > { %1010 = vmatprep.subr.bf16.mxu1 %v2563_v37 }
 0x153   : > { %v658_v43 = vpop.f32.mrb[0].mxu0  ;;  %v699_v48 = vpop.f32.mrb[0].mxu1 }
 0x154   : > { %v660_v44 = vpop.f32.mrb[1].mxu0  ;;  %v701_v51 = vpop.f32.mrb[1].mxu1 }
 0x155   : > { %v662_v45 = vpop.f32.mrb[2].mxu0  ;;  %v703_v52 = vpop.f32.mrb[2].mxu1 }
 0x156   : > { %v663_v46 = vpop.f32.mrb[3].mxu0  ;;  %v704_v53 = vpop.f32.mrb[3].mxu1  ;;  %v2626_v52 = vrot.slane %v453_v49, %v827_v61 }
 0x15b   : > { %v764_v55 = vpop.f32.mrb[4].mxu0  ;;  %v805_v29 = vpop.f32.mrb[4].mxu1 }
 0x15c   : > { %v765_v57 = vadd.f32 %v764_v55, %v658_v43  ;;  %v766_v58 = vpop.f32.mrb[5].mxu0  ;;  %v806_v38 = vadd.f32 %v805_v29, %v699_v48  ;;  %v807_v40 = vpop.f32.mrb[5].mxu1  ;;  %v823_v43 = vsub.s32 2, %v814_v42 }
 0x15d   : > { %v767_v59 = vadd.f32 %v766_v58, %v660_v44  ;;  %v768_v60 = vpop.f32.mrb[6].mxu0  ;;  %v808_v45 = vadd.f32 %v807_v40, %v701_v51  ;;  %v809_v46 = vpop.f32.mrb[6].mxu1 }
 0x15e   : > { %v833_v62 = vadd.f32 %v2620_v54, %v765_v57  ;;  %v769_v63 = vpop.f32.mrb[7].mxu0  ;;  %v810_v50 = vpop.f32.mrb[7].mxu1  ;;  %v2629_v53 = vrot.slane %v453_v49, %v823_v43  ;;  %v1099_v43 = vld [vmem:[%s1098_s27] sm:$0xff]  ;;  %s1822_s27 = sshll.u32 %s2708_s12, 2  ;;  %s2096_s12 = sshll.u32 %s2186_s21, 4  ;;  %s2097_s12 = int_to_ptr.vmem [resolvable:$false] %s2096_s12 }
 0x15f   : > { %v834_v31 = vadd.f32 %v2622_v56, %v767_v59  ;;  %v836_v44 = vadd.f32 %v2626_v52, %v808_v45  ;;  %v2642_v45 = vpop.permute.xlu0 %864  ;;  %v879_v50 = vld [vmem:[%s878_s14] sm:$0xf]  ;;  %1299 = vperm.xlu1 %1913, %v1099_v43  }
 0x160   : > { %v1803_v41 = vmul.f32 -1.442695, %v833_v62  ;;  %v835_v57 = vadd.f32 %v2629_v53, %v806_v38 }
 0x161   : > { %v1804_v47 = vmul.f32 -1.442695, %v834_v31  ;;  %v1805_v55 = vmul.f32 -1.442695, %v836_v44  ;;  %v1316_v44 = vld [vmem:[%s1315_s25] sm:$0xff]  ;;  %s1815_s25 = sshll.u32 %s2698_s16, 2  ;;  %s1312_s16 = scalar_lea.vmem %s2875_s0, %s1822_s27 }
 0x162   : > { %1968 = vpow2.f32 %v1803_v41  ;;  %s1095_s9 = scalar_lea.vmem %s2875_s0, %s1815_s25  ;;  %s2098_s27 = scalar_lea.vmem %s2097_s12, 1024 }
 0x163   : > { %1970 = vpow2.f32 %v1804_v47  ;;  %1516 = vperm.xlu1 %1913, %v1316_v44  }
 0x164   : > { %1972 = vpow2.f32 %v1805_v55 }
 0x165   : > { %1974 = vtanh.f32 %v835_v57 }
 0x16c   : > { %v1969_v58 = vpop.eup %1968 }
 0x16d   : > { %v1971_v48 = vpop.eup %1970  ;;  %v840_v59 = vadd.f32 1.0, %v1969_v58 }
 0x16e   : > { %v846_v51 = vadd.f32 1.0, %v1971_v48  ;;  %v1973_v60 = vpop.eup %1972 }
 0x16f   : > { %1976 = vrcp.f32 %v840_v59  ;;  %v1975_v42 = vpop.eup %1974  ;;  %v853_v49 = vadd.f32 1.0, %v1973_v60 }
 0x170   : > { %1978 = vrcp.f32 %v846_v51 }
 0x171   : > { %1980 = vrcp.f32 %v853_v49 }
 0x179   : > { %v1977_v61 = vpop.eup %1976 }
 0x17a   : > { %v1979_v62 = vpop.eup %1978  ;;  %v857_v63 = vmul.f32 %v1977_v61, %v1975_v42 }
 0x17b   : > { %v856_v29 = vmul.f32 0.0, %v1979_v62  ;;  %v1981_v38 = vpop.eup %1980 }
 0x17d   : > { %v2632_v31 = vadd.f32 %v857_v63, %v856_v29 }
 0x17f   : > { %1982 = vtanh.f32 %v2632_v31 }
 0x189   : > { %v1983_v40 = vpop.eup %1982 }
 0x18a   : > { %v860_v41 = vmul.f32 %v1983_v40, %v1981_v38 }
 0x18c   : > { %v2645_v46 = vmul.f32 %v2642_v45, %v860_v41 }
 0x18e   : > { %873 = vst [vmem:[%s872_s29] sm:$0xff] %v2645_v46  ;;  %v883_v47 = vpack.c.bf16 %v2645_v46, %v2645_v46  ;;  %s1307_s29 = scalar_lea.vmem %s2637_s30, %s1816_s17 [#allocation9]  ;;  %s1547_s17 = sshll.u32 %s2637_s30, 4  ;;  %s2817_s17 = int_to_ptr.vmem [resolvable:$true] %s1547_s17 }
 0x18f   : > { %p2099_p10 = scmp.lt.s32.totalorder %s2817_s17, %s2097_s12 }
 0x190   : > { %917 = vmatmul.mubr.bf16.vlgmr.msra.gmra.mrb[8].mxu0 %v883_v47  ;;  %958 = vmatmul.mubr.bf16.vlgmr.msra.gmra.mrb[8].mxu1 %v883_v47 }
 0x191   : > { %970 = vmatpush1.bf16.msra.mxu0 %v2557_v36  ;;  %1011 = vmatpush1.bf16.msra.mxu1 %v2567_v39 }
 0x192   : > { %1001 = vmatprep.mubr.bf16.mxu0 %v2885_v0  ;;  %1042 = vmatprep.mubr.bf16.mxu1 %v2885_v0 }
 0x193   : > { %1101 = vmatprep.subr.bf16.mxu0 %v2406_v1  ;;  %1142 = vmatprep.subr.bf16.mxu1 %v2420_v5 }
 0x198   : > { %1809 = vmatmul.mubr.msk.bf16.vlgmr.msra.gmra.mrb[12].mxu0 %vm726_vm0, %v879_v50  ;;  %1810 = vmatmul.mubr.msk.bf16.vlgmr.msra.gmra.mrb[12].mxu1 %vm726_vm0, %v879_v50 }
 0x199   : > { %1102 = vmatpush1.bf16.msra.mxu0 %v2409_v2  ;;  %1143 = vmatpush1.bf16.msra.mxu1 %v2427_v7 }
 0x19a   : > { %1103 = vmatprep.subr.bf16.mxu0 %v2413_v3  ;;  %1144 = vmatprep.subr.bf16.mxu1 %v2432_v8 }
 0x19b   : > { %1133 = vmatprep.mubr.bf16.mxu0 %v2885_v0  ;;  %1174 = vmatprep.mubr.bf16.mxu1 %v2885_v0 }
 0x19d   : > { %1104 = vmatpush1.bf16.msra.mxu0 %v2416_v4  ;;  %1145 = vmatpush1.bf16.msra.mxu1 %v2442_v11 }
 0x19e   : > { %1105 = vmatprep.subr.bf16.mxu0 %v2424_v6  ;;  %1146 = vmatprep.subr.bf16.mxu1 %v2447_v12 }
 0x1a1   : > { %1106 = vmatpush1.bf16.msra.mxu0 %v2436_v9  ;;  %1147 = vmatpush1.bf16.msra.mxu1 %v2454_v14 }
 0x1a2   : > { %1107 = vmatprep.subr.bf16.mxu0 %v2439_v10  ;;  %1148 = vmatprep.subr.bf16.mxu1 %v2459_v15 }
 0x1a5   : > { %1108 = vmatpush1.bf16.msra.mxu0 %v2451_v13  ;;  %1149 = vmatpush1.bf16.msra.mxu1 %v2471_v17 }
 0x1a6   : > { %1109 = vmatprep.subr.bf16.mxu0 %v2464_v16  ;;  %1150 = vmatprep.subr.bf16.mxu1 %v2481_v19 }
 0x1a9   : > { %1110 = vmatpush1.bf16.msra.mxu0 %v2477_v18  ;;  %1151 = vmatpush1.bf16.msra.mxu1 %v2494_v21 }
 0x1aa   : > { %1111 = vmatprep.subr.bf16.mxu0 %v2485_v20  ;;  %1152 = vmatprep.subr.bf16.mxu1 %v2502_v23 }
 0x1ad   : > { %1112 = vmatpush1.bf16.msra.mxu0 %v2498_v22  ;;  %1153 = vmatpush1.bf16.msra.mxu1 %v2519_v26 }
 0x1ae   : > { %1113 = vmatprep.subr.bf16.mxu0 %v2506_v24  ;;  %1154 = vmatprep.subr.bf16.mxu1 %v2524_v27 }
 0x1b1   : > { %1114 = vmatpush1.bf16.msra.mxu0 %v2516_v25  ;;  %1155 = vmatpush1.bf16.msra.mxu1 %v2537_v30 }
 0x1b2   : > { %1115 = vmatprep.subr.bf16.mxu0 %v2533_v28  ;;  %1156 = vmatprep.subr.bf16.mxu1 %v2545_v33 }
 0x1b5   : > { %1116 = vmatpush1.bf16.msra.mxu0 %v2541_v32  ;;  %1157 = vmatpush1.bf16.msra.mxu1 %v2553_v35 }
 0x1b6   : > { %1186 = vmatprep.subr.bf16.mxu0 %v2549_v34  ;;  %1227 = vmatprep.subr.bf16.mxu1 %v2563_v37 }
 0x263   : > { %v918_v55 = vpop.f32.mrb[8].mxu0  ;;  %v959_v57 = vpop.f32.mrb[8].mxu1 }
 0x264   : > { %v920_v58 = vpop.f32.mrb[9].mxu0  ;;  %v961_v48 = vpop.f32.mrb[9].mxu1 }
 0x265   : > { %v922_v59 = vpop.f32.mrb[10].mxu0  ;;  %v963_v51 = vpop.f32.mrb[10].mxu1 }
 0x266   : > { %v923_v60 = vpop.f32.mrb[11].mxu0  ;;  %v964_v42 = vpop.f32.mrb[11].mxu1 }
 0x26b   : > { %v1003_v61 = vpop.f32.mrb[12].mxu0  ;;  %v1044_v62 = vpop.f32.mrb[12].mxu1 }
 0x26c   : > { %v1004_v49 = vadd.f32 %v1003_v61, %v918_v55  ;;  %v1045_v63 = vadd.f32 %v1044_v62, %v959_v57  ;;  %v1005_v29 = vpop.f32.mrb[13].mxu0  ;;  %v1046_v38 = vpop.f32.mrb[13].mxu1 }
 0x26d   : > { %v1006_v40 = vadd.f32 %v1005_v29, %v920_v58  ;;  %v1047_v41 = vadd.f32 %v1046_v38, %v961_v48  ;;  %v1007_v47 = vpop.f32.mrb[14].mxu0  ;;  %v1048_v50 = vpop.f32.mrb[14].mxu1 }
 0x26e   : > { %v1051_v43 = vadd.f32 %v1004_v49, %v2620_v54  ;;  %v1008_v44 = vpop.f32.mrb[15].mxu0  ;;  %v1049_v0 = vpop.f32.mrb[15].mxu1  ;;  %v1053_v57 = vadd.f32 %v1045_v63, %v2629_v53 }
 0x26f   : > { %v1052_v37 = vadd.f32 %v1006_v40, %v2622_v56  ;;  %v1054_v60 = vadd.f32 %v1047_v41, %v2626_v52  ;;  %v1083_v50 = vpop.permute.xlu0 %1082 }
 0x270   : > { %v1811_v59 = vmul.f32 -1.442695, %v1051_v43 }
 0x271   : > { %v1812_v51 = vmul.f32 -1.442695, %v1052_v37  ;;  %v1813_v55 = vmul.f32 -1.442695, %v1054_v60  ;;  %v870_v37 = vmul.f32 %v2642_v45, %v2632_v31 }
 0x272   : > { %1984 = vpow2.f32 %v1811_v59 }
 0x273   : > { %1986 = vpow2.f32 %v1812_v51 }
 0x274   : > { %1988 = vpow2.f32 %v1813_v55 }
 0x275   : > { %1990 = vtanh.f32 %v1053_v57 }
 0x27c   : > { %v1985_v42 = vpop.eup %1984 }
 0x27d   : > { %v1987_v58 = vpop.eup %1986  ;;  %v1058_v48 = vadd.f32 1.0, %v1985_v42  ;;  %v2901_v42 = vmov 0  }
 0x27e   : > { %v1064_v61 = vadd.f32 1.0, %v1987_v58  ;;  %v1989_v0 = vpop.eup %1988 }
 0x27f   : > { %1992 = vrcp.f32 %v1058_v48  ;;  %v1991_v62 = vpop.eup %1990  ;;  %v1071_v40 = vadd.f32 1.0, %v1989_v0 }
 0x280   : > { %1994 = vrcp.f32 %v1064_v61 }
 0x281   : > { %1996 = vrcp.f32 %v1071_v40 }
 0x289   : > { %v1993_v49 = vpop.eup %1992 }
 0x28a   : > { %v1995_v29 = vpop.eup %1994  ;;  %v1075_v38 = vmul.f32 %v1993_v49, %v1991_v62 }
 0x28b   : > { %v1074_v63 = vmul.f32 %v1995_v29, %v870_v37  ;;  %v1997_v59 = vpop.eup %1996  ;;  %v1300_v29 = vpop.permute.xlu1 %1299 }
 0x28d   : > { %v1076_v41 = vadd.f32 %v1075_v38, %v1074_v63 }
 0x28f   : > { %1998 = vtanh.f32 %v1076_v41  ;;  %v1087_v47 = vsub.f32 %v1076_v41, %v870_v37 }
 0x291   : > { %v1088_v43 = vmul.f32 %v1087_v47, %v1083_v50 }
 0x293   : > { %v2722_v44 = vadd.f32 %v1088_v43, %v870_v37 }
 0x299   : > { %v1999_v51 = vpop.eup %1998 }
 0x29a   : > { %v1078_v60 = vmul.f32 %v1999_v51, %v1997_v59 }
 0x29c   : > { %v1079_v31 = vsub.f32 %v1078_v60, %v2645_v46 }
 0x29e   : > { %v1085_v45 = vmul.f32 %v1083_v50, %v1079_v31 }
 0x2a0   : > { %v2729_v55 = vadd.f32 %v1085_v45, %v2645_v46  ;;  %v1096_v46 = vld [vmem:[%s1095_s9] sm:$0xf]  ;;  %s1529_s9 = scalar_lea.sflag [#allocation6], %s2381_s10 }
 0x2a2   : > { %v1100_v57 = vpack.c.bf16 %v2729_v55, %v2729_v55  ;;  %1091 = vst [vmem:[%s1090_s15] sm:$0xff] %v2729_v55  ;;  %s1524_s15 = scalar_lea.vmem %s2637_s30, %s1823_s24 [#allocation9] }
 0x2a4   : > { %1134 = vmatmul.mubr.bf16.vlgmr.msra.gmra.mrb[16].mxu0 %v1100_v57  ;;  %1175 = vmatmul.mubr.bf16.vlgmr.msra.gmra.mrb[16].mxu1 %v1100_v57 }
 0x2a5   : > { %1187 = vmatpush1.bf16.msra.mxu0 %v2557_v36  ;;  %1228 = vmatpush1.bf16.msra.mxu1 %v2567_v39 }
 0x2a6   : > { %1218 = vmatprep.mubr.bf16.mxu0 %v2901_v42  ;;  %1259 = vmatprep.mubr.bf16.mxu1 %v2901_v42 }
 0x2a7   : > { %1318 = vmatprep.subr.bf16.mxu0 %v2406_v1  ;;  %1359 = vmatprep.subr.bf16.mxu1 %v2420_v5  ;;  %v2902_v1 = vld [vmem:[#allocation13_spill] sm:$0xff] }
 0x2ac   : > { %1817 = vmatmul.mubr.msk.bf16.vlgmr.msra.gmra.mrb[20].mxu0 %vm726_vm0, %v1096_v46  ;;  %1818 = vmatmul.mubr.msk.bf16.vlgmr.msra.gmra.mrb[20].mxu1 %vm726_vm0, %v1096_v46 }
 0x2ad   : > { %1319 = vmatpush1.bf16.msra.mxu0 %v2409_v2  ;;  %1360 = vmatpush1.bf16.msra.mxu1 %v2427_v7 }
 0x2ae   : > { %1320 = vmatprep.subr.bf16.mxu0 %v2413_v3  ;;  %1361 = vmatprep.subr.bf16.mxu1 %v2432_v8 }
 0x2af   : > { %1350 = vmatprep.mubr.bf16.mxu0 %v2901_v42  ;;  %1391 = vmatprep.mubr.bf16.mxu1 %v2901_v42 }
 0x2b1   : > { %1321 = vmatpush1.bf16.msra.mxu0 %v2416_v4  ;;  %1362 = vmatpush1.bf16.msra.mxu1 %v2442_v11 }
 0x2b2   : > { %1322 = vmatprep.subr.bf16.mxu0 %v2424_v6  ;;  %1363 = vmatprep.subr.bf16.mxu1 %v2447_v12 }
 0x2b5   : > { %1323 = vmatpush1.bf16.msra.mxu0 %v2436_v9  ;;  %1364 = vmatpush1.bf16.msra.mxu1 %v2454_v14 }
 0x2b6   : > { %1324 = vmatprep.subr.bf16.mxu0 %v2439_v10  ;;  %1365 = vmatprep.subr.bf16.mxu1 %v2459_v15 }
 0x2b9   : > { %1325 = vmatpush1.bf16.msra.mxu0 %v2451_v13  ;;  %1366 = vmatpush1.bf16.msra.mxu1 %v2471_v17 }
 0x2ba   : > { %1326 = vmatprep.subr.bf16.mxu0 %v2464_v16  ;;  %1367 = vmatprep.subr.bf16.mxu1 %v2481_v19 }
 0x2bd   : > { %1327 = vmatpush1.bf16.msra.mxu0 %v2477_v18  ;;  %1368 = vmatpush1.bf16.msra.mxu1 %v2494_v21 }
 0x2be   : > { %1328 = vmatprep.subr.bf16.mxu0 %v2485_v20  ;;  %1369 = vmatprep.subr.bf16.mxu1 %v2502_v23 }
 0x2c1   : > { %1329 = vmatpush1.bf16.msra.mxu0 %v2498_v22  ;;  %1370 = vmatpush1.bf16.msra.mxu1 %v2519_v26 }
 0x2c2   : > { %1330 = vmatprep.subr.bf16.mxu0 %v2506_v24  ;;  %1371 = vmatprep.subr.bf16.mxu1 %v2524_v27 }
 0x2c5   : > { %1331 = vmatpush1.bf16.msra.mxu0 %v2516_v25  ;;  %1372 = vmatpush1.bf16.msra.mxu1 %v2537_v30 }
 0x2c6   : > { %1332 = vmatprep.subr.bf16.mxu0 %v2533_v28  ;;  %1373 = vmatprep.subr.bf16.mxu1 %v2545_v33 }
 0x2c9   : > { %1333 = vmatpush1.bf16.msra.mxu0 %v2541_v32  ;;  %1374 = vmatpush1.bf16.msra.mxu1 %v2553_v35 }
 0x2ca   : > { %1403 = vmatprep.subr.bf16.mxu0 %v2549_v34  ;;  %1444 = vmatprep.subr.bf16.mxu1 %v2902_v1 }
 0x377   : > { %v1135_v2 = vpop.f32.mrb[16].mxu0  ;;  %v1176_v3 = vpop.f32.mrb[16].mxu1 }
 0x378   : > { %v1137_v4 = vpop.f32.mrb[17].mxu0  ;;  %v1178_v5 = vpop.f32.mrb[17].mxu1 }
 0x379   : > { %v1139_v6 = vpop.f32.mrb[18].mxu0  ;;  %v1180_v7 = vpop.f32.mrb[18].mxu1 }
 0x37a   : > { %v1140_v8 = vpop.f32.mrb[19].mxu0  ;;  %v1181_v9 = vpop.f32.mrb[19].mxu1 }
 0x37f   : > { %v1220_v10 = vpop.f32.mrb[20].mxu0  ;;  %v1261_v11 = vpop.f32.mrb[20].mxu1 }
 0x380   : > { %v1221_v12 = vadd.f32 %v1220_v10, %v1135_v2  ;;  %v1262_v13 = vadd.f32 %v1261_v11, %v1176_v3  ;;  %v1222_v14 = vpop.f32.mrb[21].mxu0  ;;  %v1263_v15 = vpop.f32.mrb[21].mxu1 }
 0x381   : > { %v1223_v16 = vadd.f32 %v1222_v14, %v1137_v4  ;;  %v1264_v17 = vadd.f32 %v1263_v15, %v1178_v5  ;;  %v1224_v18 = vpop.f32.mrb[22].mxu0  ;;  %v1265_v19 = vpop.f32.mrb[22].mxu1 }
 0x382   : > { %v1268_v20 = vadd.f32 %v1221_v12, %v2620_v54  ;;  %v1225_v21 = vpop.f32.mrb[23].mxu0  ;;  %v1266_v22 = vpop.f32.mrb[23].mxu1  ;;  %v1270_v28 = vadd.f32 %v1262_v13, %v2629_v53 }
 0x383   : > { %v1269_v23 = vadd.f32 %v1223_v16, %v2622_v56  ;;  %v1271_v26 = vadd.f32 %v1264_v17, %v2626_v52 }
 0x384   : > { %v1819_v24 = vmul.f32 -1.442695, %v1268_v20 }
 0x385   : > { %v1820_v25 = vmul.f32 -1.442695, %v1269_v23  ;;  %v1821_v27 = vmul.f32 -1.442695, %v1271_v26 }
 0x386   : > { %2000 = vpow2.f32 %v1819_v24 }
 0x387   : > { %2002 = vpow2.f32 %v1820_v25 }
 0x388   : > { %2004 = vpow2.f32 %v1821_v27 }
 0x389   : > { %2006 = vtanh.f32 %v1270_v28 }
 0x390   : > { %v2001_v30 = vpop.eup %2000 }
 0x391   : > { %v2003_v32 = vpop.eup %2002  ;;  %v1275_v33 = vadd.f32 1.0, %v2001_v30 }
 0x392   : > { %v1281_v34 = vadd.f32 1.0, %v2003_v32  ;;  %v2005_v35 = vpop.eup %2004 }
 0x393   : > { %2008 = vrcp.f32 %v1275_v33  ;;  %v2007_v58 = vpop.eup %2006  ;;  %v1288_v0 = vadd.f32 1.0, %v2005_v35 }
 0x394   : > { %2010 = vrcp.f32 %v1281_v34  ;;  %v1517_v34 = vpop.permute.xlu1 %1516 }
 0x395   : > { %2012 = vrcp.f32 %v1288_v0 }
 0x39d   : > { %v2009_v48 = vpop.eup %2008 }
 0x39e   : > { %v2011_v61 = vpop.eup %2010  ;;  %v1292_v62 = vmul.f32 %v2009_v48, %v2007_v58 }
 0x39f   : > { %v1291_v49 = vmul.f32 %v2011_v61, %v2722_v44  ;;  %v2013_v41 = vpop.eup %2012 }
 0x3a1   : > { %v1293_v37 = vadd.f32 %v1292_v62, %v1291_v49 }
 0x3a3   : > { %2014 = vtanh.f32 %v1293_v37  ;;  %v1304_v38 = vsub.f32 %v1293_v37, %v2722_v44 }
 0x3a5   : > { %v1305_v40 = vmul.f32 %v1304_v38, %v1300_v29 }
 0x3a7   : > { %v2787_v63 = vadd.f32 %v1305_v40, %v2722_v44  ;;  %v1313_v44 = vld [vmem:[%s1312_s16] sm:$0xf] }
 0x3ad   : > { %v2015_v47 = vpop.eup %2014 }
 0x3ae   : > { %v1295_v50 = vmul.f32 %v2015_v47, %v2013_v41 }
 0x3b0   : > { %v1296_v43 = vsub.f32 %v1295_v50, %v2729_v55 }
 0x3b2   : > { %v1302_v59 = vmul.f32 %v1300_v29, %v1296_v43 }
 0x3b4   : > { %v2794_v51 = vadd.f32 %v1302_v59, %v2729_v55 }
 0x3b6   : > { %1308 = vst [vmem:[%s1307_s29] sm:$0xff] %v2794_v51  ;;  %v1317_v60 = vpack.c.bf16 %v2794_v51, %v2794_v51  ;;  %s2092_s29 = scalar_lea.vmem %s2817_s17, 512 }
 0x3b7   : > { %p2093_p3 = scmp.ne.s32.totalorder %s2817_s17, %s2092_s29  ;;  %p2100_p9 = scmp.lt.s32.totalorder %s2098_s27, %s2092_s29 }
 0x3b8   : > { %1351 = vmatmul.mubr.bf16.vlgmr.msra.gmra.mrb[24].mxu0 %v1317_v60  ;;  %1392 = vmatmul.mubr.bf16.vlgmr.msra.gmra.mrb[24].mxu1 %v1317_v60 }
 0x3b9   : > { %1404 = vmatpush1.bf16.msra.mxu0 %v2557_v36  ;;  %1445 = vmatpush1.bf16.msra.mxu1 %v2567_v39  ;;  %p2094_p13 = pnand %p2093_p3, %p2903_p12  ;;  %p2101_p11 = por %p2100_p9, %p2099_p10 }
 0x3ba   : > { %1435 = vmatprep.mubr.bf16.mxu0 %v2901_v42  ;;  %1476 = vmatprep.mubr.bf16.mxu1 %v2901_v42 }
 0x3bb   : > { %p2095_p7 = pneg %p2094_p13 }
 0x3bd   : > { %p2102_p1 = pnand %p2101_p11, %p2095_p7 }
 0x3c0   : > { %1824 = vmatmul.mubr.msk.bf16.vlgmr.msra.gmra.mrb[28].mxu0 %vm726_vm0, %v1313_v44  ;;  %1825 = vmatmul.mubr.msk.bf16.vlgmr.msra.gmra.mrb[28].mxu1 %vm726_vm0, %v1313_v44 }
 0x48b   : > { %v1352_v31 = vpop.f32.mrb[24].mxu0  ;;  %v1393_v45 = vpop.f32.mrb[24].mxu1 }
 0x48c   : > { %v1354_v55 = vpop.f32.mrb[25].mxu0  ;;  %v1395_v57 = vpop.f32.mrb[25].mxu1 }
 0x48d   : > { %v1356_v36 = vpop.f32.mrb[26].mxu0  ;;  %v1397_v46 = vpop.f32.mrb[26].mxu1 }
 0x48e   : > { %v1357_v39 = vpop.f32.mrb[27].mxu0  ;;  %v1398_v1 = vpop.f32.mrb[27].mxu1 }
 0x493   : > { %v1437_v2 = vpop.f32.mrb[28].mxu0  ;;  %v1478_v3 = vpop.f32.mrb[28].mxu1 }
 0x494   : > { %v1438_v4 = vadd.f32 %v1437_v2, %v1352_v31  ;;  %v1479_v5 = vadd.f32 %v1478_v3, %v1393_v45  ;;  %v1439_v6 = vpop.f32.mrb[29].mxu0  ;;  %v1480_v7 = vpop.f32.mrb[29].mxu1 }
 0x495   : > { %v1440_v42 = vadd.f32 %v1439_v6, %v1354_v55  ;;  %v1481_v8 = vadd.f32 %v1480_v7, %v1395_v57  ;;  %v1441_v9 = vpop.f32.mrb[30].mxu0  ;;  %v1482_v10 = vpop.f32.mrb[30].mxu1 }
 0x496   : > { %v1485_v11 = vadd.f32 %v1438_v4, %v2620_v54  ;;  %v1442_v12 = vpop.f32.mrb[31].mxu0  ;;  %v1483_v13 = vpop.f32.mrb[31].mxu1  ;;  %v1487_v19 = vadd.f32 %v1479_v5, %v2629_v53 }
 0x497   : > { %v1486_v14 = vadd.f32 %v1440_v42, %v2622_v56  ;;  %v1488_v17 = vadd.f32 %v1481_v8, %v2626_v52 }
 0x498   : > { %v1826_v15 = vmul.f32 -1.442695, %v1485_v11 }
 0x499   : > { %v1827_v16 = vmul.f32 -1.442695, %v1486_v14  ;;  %v1828_v18 = vmul.f32 -1.442695, %v1488_v17 }
 0x49a   : > { %2016 = vpow2.f32 %v1826_v15 }
 0x49b   : > { %2018 = vpow2.f32 %v1827_v16 }
 0x49c   : > { %2020 = vpow2.f32 %v1828_v18 }
 0x49d   : > { %2022 = vtanh.f32 %v1487_v19 }
 0x4a4   : > { %v2017_v20 = vpop.eup %2016 }
 0x4a5   : > { %v2019_v21 = vpop.eup %2018  ;;  %v1492_v22 = vadd.f32 1.0, %v2017_v20 }
 0x4a6   : > { %v1498_v23 = vadd.f32 1.0, %v2019_v21  ;;  %v2021_v54 = vpop.eup %2020 }
 0x4a7   : > { %2024 = vrcp.f32 %v1492_v22  ;;  %v2023_v56 = vpop.eup %2022  ;;  %v1505_v26 = vadd.f32 1.0, %v2021_v54 }
 0x4a8   : > { %2026 = vrcp.f32 %v1498_v23 }
 0x4a9   : > { %2028 = vrcp.f32 %v1505_v26 }
 0x4b1   : > { %v2025_v24 = vpop.eup %2024 }
 0x4b2   : > { %v2027_v25 = vpop.eup %2026  ;;  %v1509_v52 = vmul.f32 %v2025_v24, %v2023_v56 }
 0x4b3   : > { %v1508_v53 = vmul.f32 %v2027_v25, %v2787_v63  ;;  %v2029_v28 = vpop.eup %2028 }
 0x4b5   : > { %v1510_v27 = vadd.f32 %v1509_v52, %v1508_v53 }
 0x4b7   : > { %2030 = vtanh.f32 %v1510_v27 }
 0x4c1   : > { %v2031_v30 = vpop.eup %2030 }
 0x4c2   : > { %v1512_v32 = vmul.f32 %v2031_v30, %v2029_v28 }
 0x4c4   : > { %v1513_v33 = vsub.f32 %v1512_v32, %v2794_v51 }
 0x4c6   : > { %v1519_v35 = vmul.f32 %v1517_v34, %v1513_v33 }
 0x4c8   : > { %v1520_v58 = vadd.f32 %v1519_v35, %v2794_v51 }
 0x4ca   : > { %1525 = vst [vmem:[%s1524_s15] sm:$0xff] %v1520_v58 }
 0x4cb   : > { %2105 = shalt.err (!%p2102_p1)
}
 0x4cc   : > { %s2106_s30 = scalar_lea.hbm %s2825_s2, 512  ;;  %s2110_s13 = scalar_lea.hbm %s2880_s5, 1024 }
 0x4cd   : > { %p2107_p6 = scmp.ne.s32.totalorder %s2825_s2, %s2106_s30  ;;  %p2111_p4 = scmp.lt.u32.totalorder %s2825_s2, %s2880_s5 }
 0x4ce   : > { %p2112_p8 = scmp.lt.u32.totalorder %s2110_s13, %s2106_s30  ;;  %p2114_p3 = scmp.lt.u32.totalorder %s2106_s30, %s2825_s2 }
 0x4cf   : > { %p2108_p2 = pnand %p2107_p6, %p2903_p12 }
 0x4d0   : > { %p2113_p0 = por %p2112_p8, %p2111_p4 }
 0x4d1   : > { %p2109_p5 = pneg %p2108_p2 }
 0x4d2   : > { %p2115_p13 = por %p2114_p3, %p2113_p0 }
 0x4d4   : > { %p2116_p7 = pnand %p2115_p13, %p2109_p5 }
 0x4d6   : > { %2119 = shalt.err (!%p2116_p7)
}
 0x4d7   : > { %s2187_s15 = smov 128   ;;  %s2188_s25 = smov 8  }
 0x4d8   : > { %1843 = dma.vmem_to_hbm [thread:$0]  (%p2903_p12), %s2817_s17, 512, %s2825_s2, %s1529_s9, %s2187_s15, %s2187_s15, %s2188_s25  }
 0x4d9 PF: > { %s1562_s28 = sand.u32 1, %s2158_s18   ;;  %p2904_p10 = scmp.ne.s32.totalorder %s2892_s8, 0 }
 0x4da   : > { %p2905_p9 = scmp.ge.s32.totalorder %s2178_s23, 2  ;;  %s1563_s29 = scalar_lea.sflag [#allocation6], %s1562_s28 }
 0x4dc   : > { %p1853_p11 = pnand %p2905_p9, %p2904_p10 }
 0x4de   : > { %2153 = dma.done.wait (!%p1853_p11), %s1563_s29, 512  }
 0x4df   : > { %2155 = vsyncadd (!%p1853_p11), %s1563_s29, 4294966784  ;;  %s24_s23 = sadd.s32 1, %s2178_s23   ;;  %s2906_s18 = smov %s2162_s19 }
 0x4e0   : > { %p21_p1 = scmp.ge.s32.totalorder %s24_s23, 4   ;;  %s2907_s19 = smov %s2166_s20 }
 0x4e1   : > { %s2908_s20 = smov %s2275_s7  ;;  %s2909_s21 = smov %s2174_s22 }
 0x4e2   : > { %s2910_s22 = smov %s2912_s26  ;;  %23 = sbr.rel (!%p21_p1) target bundleno = 10 (0xa), region = 123 }
 0x4e9   :  { %1568 = vsyncpa [#allocation5], 1 }
 0x4ea   :  { %1570 = vsyncpa [#allocation5 + $0x1], 1 }
 0x4eb   :  { %1571 = vsyncpa [#allocation8], 1 }
 0x4ec   :  { %1573 = vsyncpa [#allocation8 + $0x1], 1 }
 0x4ed   :  { %1574 = vsyncpa [#allocation6], 1 }
 0x4ee   :  { %1576 = vsyncpa [#allocation6 + $0x1], 1 }

</bundles_post_ra>
